<compile_context>
chip_gen: v6e
topology: v6e:2x2x1
jax: 0.10.0
libtpu: 0.0.40
codegen_flags: <defaults>
</compile_context>

<pallas_src>
import functools

import jax
import jax.numpy as jnp
import numpy as np
from jax.experimental import pallas as pl
from jax.experimental.pallas import tpu as pltpu


def _round_up(x, m):
    return (x + m - 1) // m * m


def lstm_kernel(x_ref, wih_ref, bias_ref, whh_ref, wout_ref, bout_ref,
                out_ref, xw_ref, *, t_steps):
    """Fused input projection + LSTM recurrence + final linear.

    x_ref   : (T*B_pad, I_pad)     time-major padded input, row block t = timestep t
    wih_ref : (I_pad, 4*H_pad)     W_ih^T, gate order [i|f|o|g], per-gate padded
    bias_ref: (1, 4*H_pad)         b_ih + b_hh, same ordering/padding
    whh_ref : (H_pad, 4*H_pad)     W_hh^T, same ordering/padding
    wout_ref: (H_pad, O_pad)       W_out^T
    bout_ref: (1, O_pad)
    out_ref : (B_pad, O_pad)
    xw_ref  : (T*B_pad, 4*H_pad)   VMEM scratch for the hoisted x-projection
    """
    B_pad = x_ref.shape[0] // t_steps
    H_pad = whh_ref.shape[0]

    # ---- Prologue (one matmul, off the serial chain):
    #      xw = x @ W_ih^T + (b_ih + b_hh), for all timesteps at once.
    xw_ref[...] = (jnp.dot(x_ref[...], wih_ref[...],
                           preferred_element_type=jnp.float32)
                   + bias_ref[...])

    # ---- Serial recurrence, statically unrolled (T small & static).
    h = jnp.zeros((B_pad, H_pad), jnp.float32)
    c = jnp.zeros((B_pad, H_pad), jnp.float32)
    for t in range(t_steps):
        gates = (xw_ref[pl.ds(t * B_pad, B_pad), :]
                 + jnp.dot(h, whh_ref[...], preferred_element_type=jnp.float32))
        # sigmoid(x) == 0.5 * (tanh(0.5 * x) + 1): single EUP op per vreg.
        ifo = 0.5 * (jnp.tanh(0.5 * gates[:, :3 * H_pad]) + 1.0)
        g = jnp.tanh(gates[:, 3 * H_pad:])
        i = ifo[:, 0 * H_pad:1 * H_pad]
        f = ifo[:, 1 * H_pad:2 * H_pad]
        o = ifo[:, 2 * H_pad:3 * H_pad]
        c = f * c + i * g
        h = o * jnp.tanh(c)

    out_ref[...] = (jnp.dot(h, wout_ref[...], preferred_element_type=jnp.float32)
                    + bout_ref[...])


def prepare_params(params, input_size=5, hidden_size=50, output_size=1):
    """One-time host-side repack of PyTorch-layout params into kernel layout.

    Call once and cache; outputs are device arrays passed to every forward call.
    """
    w_ih, w_hh, b_ih, b_hh, w_out, b_out = (np.asarray(p, np.float32) for p in params)
    I, H, O = input_size, hidden_size, output_size
    I_pad = _round_up(max(I, 8), 8)
    H_pad = _round_up(max(H, 128), 128)
    O_pad = _round_up(max(O, 128), 128)

    # PyTorch gate order [i|f|g|o] -> kernel order [i|f|o|g] (sigmoid gates contiguous).
    perm = np.array([0, 1, 3, 2])

    w_ih4 = np.pad(w_ih.reshape(4, H, I)[perm],
                   ((0, 0), (0, H_pad - H), (0, I_pad - I)))
    wih_p = np.transpose(w_ih4, (2, 0, 1)).reshape(I_pad, 4 * H_pad)

    bias4 = (b_ih + b_hh).reshape(4, H)[perm]
    bias_p = np.pad(bias4, ((0, 0), (0, H_pad - H))).reshape(1, 4 * H_pad)

    w_hh4 = np.pad(w_hh.reshape(4, H, H)[perm],
                   ((0, 0), (0, H_pad - H), (0, H_pad - H)))
    whh_p = np.transpose(w_hh4, (2, 0, 1)).reshape(H_pad, 4 * H_pad)

    wout_p = np.pad(w_out.T, ((0, H_pad - H), (0, O_pad - O)))
    bout_p = np.pad(b_out.reshape(1, O), ((0, 0), (0, O_pad - O)))

    return tuple(jnp.asarray(a, jnp.float32)
                 for a in (wih_p, bias_p, whh_p, wout_p, bout_p))


@functools.partial(jax.jit, static_argnames=("output_size",))
def lstm_model_forward(x, packed_params, output_size=1):
    """x: (B, T, I) float32, batch_first.  Returns (B, output_size) = linear(h_T)."""
    wih_p, bias_p, whh_p, wout_p, bout_p = packed_params
    B, T, I = x.shape
    I_pad = wih_p.shape[0]
    H_pad = whh_p.shape[0]
    O_pad = wout_p.shape[1]
    B_pad = _round_up(max(B, 8), 8)

    # Only data-dependent prep left per call: time-major + pad + flatten (tiny).
    xp = jnp.transpose(x, (1, 0, 2))                                   # (T, B, I)
    xp = jnp.pad(xp, ((0, 0), (0, B_pad - B), (0, I_pad - I)))         # (T, B_pad, I_pad)
    xp = xp.reshape(T * B_pad, I_pad)

    out_pad = pl.pallas_call(
        functools.partial(lstm_kernel, t_steps=T),
        out_shape=jax.ShapeDtypeStruct((B_pad, O_pad), jnp.float32),
        in_specs=[pl.BlockSpec(memory_space=pltpu.MemorySpace.VMEM)] * 6,
        out_specs=pl.BlockSpec(memory_space=pltpu.MemorySpace.VMEM),
        scratch_shapes=[pltpu.VMEM((T * B_pad, 4 * H_pad), jnp.float32)],
    )(xp, wih_p, bias_p, whh_p, wout_p, bout_p)

    return out_pad[:B, :output_size]


def init_params(key, input_size=5, hidden_size=50, output_size=1):
    """Deterministic init mimicking PyTorch's U(-1/sqrt(H), 1/sqrt(H))."""
    H, I, O = hidden_size, input_size, output_size
    k = 1.0 / np.sqrt(H)
    keys = jax.random.split(key, 6)
    w_ih = jax.random.uniform(keys[0], (4 * H, I), jnp.float32, -k, k)
    w_hh = jax.random.uniform(keys[1], (4 * H, H), jnp.float32, -k, k)
    b_ih = jax.random.uniform(keys[2], (4 * H,), jnp.float32, -k, k)
    b_hh = jax.random.uniform(keys[3], (4 * H,), jnp.float32, -k, k)
    w_out = jax.random.uniform(keys[4], (O, H), jnp.float32, -k, k)
    b_out = jax.random.uniform(keys[5], (O,), jnp.float32, -k, k)
    return (w_ih, w_hh, b_ih, b_hh, w_out, b_out)


def reference_forward(x, params, hidden_size=50):
    """Pure-JAX reference matching PyTorch nn.LSTM + Linear semantics."""
    w_ih, w_hh, b_ih, b_hh, w_out, b_out = params
    B, T, I = x.shape
    H = hidden_size
    h = jnp.zeros((B, H), jnp.float32)
    c = jnp.zeros((B, H), jnp.float32)
    for t in range(T):
        gates = x[:, t] @ w_ih.T + b_ih + h @ w_hh.T + b_hh
        i = jax.nn.sigmoid(gates[:, 0 * H:1 * H])
        f = jax.nn.sigmoid(gates[:, 1 * H:2 * H])
        g = jnp.tanh(gates[:, 2 * H:3 * H])
        o = jax.nn.sigmoid(gates[:, 3 * H:4 * H])
        c = f * c + i * g
        h = o * jnp.tanh(c)
    return h @ w_out.T + b_out


if __name__ == "__main__":
    key = jax.random.PRNGKey(0)
    kx, kp = jax.random.split(key)

    B, T, I, H, O = 2, 8, 5, 50, 1
    x = jax.random.normal(kx, (B, T, I), jnp.float32)
    params = init_params(kp, input_size=I, hidden_size=H, output_size=O)

    # One-time parameter repack (cache this across calls).
    packed = prepare_params(params, input_size=I, hidden_size=H, output_size=O)

    out = lstm_model_forward(x, packed, output_size=O)
    out = jax.block_until_ready(out)

    ref = reference_forward(x, params, hidden_size=H)
    np.testing.assert_allclose(np.asarray(out), np.asarray(ref),
                               rtol=1e-5, atol=1e-5)
    assert out.shape == (B, O)
    print("KERNEL_OK")
</pallas_src>

<mosaic_0001>
module attributes {stable_mosaic.version = 11 : i64} {
  func.func @lstm_kernel(%arg0: memref<64x8xf32, #tpu.memory_space<vmem>>, %arg1: memref<8x512xf32, #tpu.memory_space<vmem>>, %arg2: memref<1x512xf32, #tpu.memory_space<vmem>>, %arg3: memref<128x512xf32, #tpu.memory_space<vmem>>, %arg4: memref<128x128xf32, #tpu.memory_space<vmem>>, %arg5: memref<1x128xf32, #tpu.memory_space<vmem>>, %arg6: memref<8x128xf32, #tpu.memory_space<vmem>>, %arg7: memref<64x512xf32, #tpu.memory_space<vmem>>) attributes {dimension_semantics = [], scalar_prefetch = 0 : i64, scratch_operands = 1 : i64, tpu.core_type = #tpu.core_type<tc>} {
    %c0 = arith.constant 0 : index
    %c0_0 = arith.constant 0 : index
    %0 = vector.load %arg0[%c0, %c0_0] : memref<64x8xf32, #tpu.memory_space<vmem>>, vector<64x8xf32>
    %c0_1 = arith.constant 0 : index
    %c0_2 = arith.constant 0 : index
    %1 = vector.load %arg1[%c0_1, %c0_2] : memref<8x512xf32, #tpu.memory_space<vmem>>, vector<8x512xf32>
    %cst = arith.constant dense<0.000000e+00> : vector<64x512xf32>
    %2 = tpu.matmul %0, %1, %cst {dimension_numbers = #tpu.dot_dimension_numbers<[1], [0], [0], [1], [0, 0, 1, 1], [], []>} : vector<64x8xf32>, vector<8x512xf32>, vector<64x512xf32> -> vector<64x512xf32>
    %c0_3 = arith.constant 0 : index
    %c0_4 = arith.constant 0 : index
    %3 = vector.load %arg2[%c0_3, %c0_4] : memref<1x512xf32, #tpu.memory_space<vmem>>, vector<1x512xf32>
    %4 = vector.broadcast %3 : vector<1x512xf32> to vector<64x512xf32>
    %5 = arith.addf %2, %4 : vector<64x512xf32>
    %c0_5 = arith.constant 0 : index
    %c0_6 = arith.constant 0 : index
    %6 = vector.load %arg7[%c0_5, %c0_6] : memref<64x512xf32, #tpu.memory_space<vmem>>, vector<64x512xf32>
    tpu.vector_store %arg7[%c0_5, %c0_6], %5 {strides = array<i32>} : memref<64x512xf32, #tpu.memory_space<vmem>>, vector<64x512xf32>,
    %cst_7 = arith.constant 0.000000e+00 : f32
    %7 = vector.broadcast %cst_7 : f32 to vector<8x128xf32>
    %cst_8 = arith.constant 0.000000e+00 : f32
    %8 = vector.broadcast %cst_8 : f32 to vector<8x128xf32>
    %c0_9 = arith.constant 0 : index
    %c0_10 = arith.constant 0 : index
    %9 = vector.load %arg7[%c0_9, %c0_10] : memref<64x512xf32, #tpu.memory_space<vmem>>, vector<8x512xf32>
    %c0_11 = arith.constant 0 : index
    %c0_12 = arith.constant 0 : index
    %10 = vector.load %arg3[%c0_11, %c0_12] : memref<128x512xf32, #tpu.memory_space<vmem>>, vector<128x512xf32>
    %cst_13 = arith.constant dense<0.000000e+00> : vector<8x512xf32>
    %11 = tpu.matmul %7, %10, %cst_13 {dimension_numbers = #tpu.dot_dimension_numbers<[1], [0], [0], [1], [0, 0, 1, 1], [], []>} : vector<8x128xf32>, vector<128x512xf32>, vector<8x512xf32> -> vector<8x512xf32>
    %12 = arith.addf %9, %11 : vector<8x512xf32>
    %13 = vector.extract_strided_slice %12 {offsets = [0, 0], sizes = [8, 384], strides = [1, 1]} : vector<8x512xf32> to vector<8x384xf32>
    %cst_14 = arith.constant 5.000000e-01 : f32
    %14 = vector.broadcast %cst_14 : f32 to vector<8x384xf32>
    %15 = arith.mulf %14, %13 : vector<8x384xf32>
    %16 = math.tanh %15 : vector<8x384xf32>
    %cst_15 = arith.constant 1.000000e+00 : f32
    %17 = vector.broadcast %cst_15 : f32 to vector<8x384xf32>
    %18 = arith.addf %16, %17 : vector<8x384xf32>
    %cst_16 = arith.constant 5.000000e-01 : f32
    %19 = vector.broadcast %cst_16 : f32 to vector<8x384xf32>
    %20 = arith.mulf %19, %18 : vector<8x384xf32>
    %21 = vector.extract_strided_slice %12 {offsets = [0, 384], sizes = [8, 128], strides = [1, 1]} : vector<8x512xf32> to vector<8x128xf32>
    %22 = math.tanh %21 : vector<8x128xf32>
    %23 = vector.extract_strided_slice %20 {offsets = [0, 0], sizes = [8, 128], strides = [1, 1]} : vector<8x384xf32> to vector<8x128xf32>
    %24 = vector.extract_strided_slice %20 {offsets = [0, 128], sizes = [8, 128], strides = [1, 1]} : vector<8x384xf32> to vector<8x128xf32>
    %25 = vector.extract_strided_slice %20 {offsets = [0, 256], sizes = [8, 128], strides = [1, 1]} : vector<8x384xf32> to vector<8x128xf32>
    %26 = arith.mulf %24, %8 : vector<8x128xf32>
    %27 = arith.mulf %23, %22 : vector<8x128xf32>
    %28 = arith.addf %26, %27 : vector<8x128xf32>
    %29 = math.tanh %28 : vector<8x128xf32>
    %30 = arith.mulf %25, %29 : vector<8x128xf32>
    %c8 = arith.constant 8 : index
    %c0_17 = arith.constant 0 : index
    %31 = vector.load %arg7[%c8, %c0_17] : memref<64x512xf32, #tpu.memory_space<vmem>>, vector<8x512xf32>
    %c0_18 = arith.constant 0 : index
    %c0_19 = arith.constant 0 : index
    %32 = vector.load %arg3[%c0_18, %c0_19] : memref<128x512xf32, #tpu.memory_space<vmem>>, vector<128x512xf32>
    %cst_20 = arith.constant dense<0.000000e+00> : vector<8x512xf32>
    %33 = tpu.matmul %30, %32, %cst_20 {dimension_numbers = #tpu.dot_dimension_numbers<[1], [0], [0], [1], [0, 0, 1, 1], [], []>} : vector<8x128xf32>, vector<128x512xf32>, vector<8x512xf32> -> vector<8x512xf32>
    %34 = arith.addf %31, %33 : vector<8x512xf32>
    %35 = vector.extract_strided_slice %34 {offsets = [0, 0], sizes = [8, 384], strides = [1, 1]} : vector<8x512xf32> to vector<8x384xf32>
    %cst_21 = arith.constant 5.000000e-01 : f32
    %36 = vector.broadcast %cst_21 : f32 to vector<8x384xf32>
    %37 = arith.mulf %36, %35 : vector<8x384xf32>
    %38 = math.tanh %37 : vector<8x384xf32>
    %cst_22 = arith.constant 1.000000e+00 : f32
    %39 = vector.broadcast %cst_22 : f32 to vector<8x384xf32>
    %40 = arith.addf %38, %39 : vector<8x384xf32>
    %cst_23 = arith.constant 5.000000e-01 : f32
    %41 = vector.broadcast %cst_23 : f32 to vector<8x384xf32>
    %42 = arith.mulf %41, %40 : vector<8x384xf32>
    %43 = vector.extract_strided_slice %34 {offsets = [0, 384], sizes = [8, 128], strides = [1, 1]} : vector<8x512xf32> to vector<8x128xf32>
    %44 = math.tanh %43 : vector<8x128xf32>
    %45 = vector.extract_strided_slice %42 {offsets = [0, 0], sizes = [8, 128], strides = [1, 1]} : vector<8x384xf32> to vector<8x128xf32>
    %46 = vector.extract_strided_slice %42 {offsets = [0, 128], sizes = [8, 128], strides = [1, 1]} : vector<8x384xf32> to vector<8x128xf32>
    %47 = vector.extract_strided_slice %42 {offsets = [0, 256], sizes = [8, 128], strides = [1, 1]} : vector<8x384xf32> to vector<8x128xf32>
    %48 = arith.mulf %46, %28 : vector<8x128xf32>
    %49 = arith.mulf %45, %44 : vector<8x128xf32>
    %50 = arith.addf %48, %49 : vector<8x128xf32>
    %51 = math.tanh %50 : vector<8x128xf32>
    %52 = arith.mulf %47, %51 : vector<8x128xf32>
    %c16 = arith.constant 16 : index
    %c0_24 = arith.constant 0 : index
    %53 = vector.load %arg7[%c16, %c0_24] : memref<64x512xf32, #tpu.memory_space<vmem>>, vector<8x512xf32>
    %c0_25 = arith.constant 0 : index
    %c0_26 = arith.constant 0 : index
    %54 = vector.load %arg3[%c0_25, %c0_26] : memref<128x512xf32, #tpu.memory_space<vmem>>, vector<128x512xf32>
    %cst_27 = arith.constant dense<0.000000e+00> : vector<8x512xf32>
    %55 = tpu.matmul %52, %54, %cst_27 {dimension_numbers = #tpu.dot_dimension_numbers<[1], [0], [0], [1], [0, 0, 1, 1], [], []>} : vector<8x128xf32>, vector<128x512xf32>, vector<8x512xf32> -> vector<8x512xf32>
    %56 = arith.addf %53, %55 : vector<8x512xf32>
    %57 = vector.extract_strided_slice %56 {offsets = [0, 0], sizes = [8, 384], strides = [1, 1]} : vector<8x512xf32> to vector<8x384xf32>
    %cst_28 = arith.constant 5.000000e-01 : f32
    %58 = vector.broadcast %cst_28 : f32 to vector<8x384xf32>
    %59 = arith.mulf %58, %57 : vector<8x384xf32>
    %60 = math.tanh %59 : vector<8x384xf32>
    %cst_29 = arith.constant 1.000000e+00 : f32
    %61 = vector.broadcast %cst_29 : f32 to vector<8x384xf32>
    %62 = arith.addf %60, %61 : vector<8x384xf32>
    %cst_30 = arith.constant 5.000000e-01 : f32
    %63 = vector.broadcast %cst_30 : f32 to vector<8x384xf32>
    %64 = arith.mulf %63, %62 : vector<8x384xf32>
    %65 = vector.extract_strided_slice %56 {offsets = [0, 384], sizes = [8, 128], strides = [1, 1]} : vector<8x512xf32> to vector<8x128xf32>
    %66 = math.tanh %65 : vector<8x128xf32>
    %67 = vector.extract_strided_slice %64 {offsets = [0, 0], sizes = [8, 128], strides = [1, 1]} : vector<8x384xf32> to vector<8x128xf32>
    %68 = vector.extract_strided_slice %64 {offsets = [0, 128], sizes = [8, 128], strides = [1, 1]} : vector<8x384xf32> to vector<8x128xf32>
    %69 = vector.extract_strided_slice %64 {offsets = [0, 256], sizes = [8, 128], strides = [1, 1]} : vector<8x384xf32> to vector<8x128xf32>
    %70 = arith.mulf %68, %50 : vector<8x128xf32>
    %71 = arith.mulf %67, %66 : vector<8x128xf32>
    %72 = arith.addf %70, %71 : vector<8x128xf32>
    %73 = math.tanh %72 : vector<8x128xf32>
    %74 = arith.mulf %69, %73 : vector<8x128xf32>
    %c24 = arith.constant 24 : index
    %c0_31 = arith.constant 0 : index
    %75 = vector.load %arg7[%c24, %c0_31] : memref<64x512xf32, #tpu.memory_space<vmem>>, vector<8x512xf32>
    %c0_32 = arith.constant 0 : index
    %c0_33 = arith.constant 0 : index
    %76 = vector.load %arg3[%c0_32, %c0_33] : memref<128x512xf32, #tpu.memory_space<vmem>>, vector<128x512xf32>
    %cst_34 = arith.constant dense<0.000000e+00> : vector<8x512xf32>
    %77 = tpu.matmul %74, %76, %cst_34 {dimension_numbers = #tpu.dot_dimension_numbers<[1], [0], [0], [1], [0, 0, 1, 1], [], []>} : vector<8x128xf32>, vector<128x512xf32>, vector<8x512xf32> -> vector<8x512xf32>
    %78 = arith.addf %75, %77 : vector<8x512xf32>
    %79 = vector.extract_strided_slice %78 {offsets = [0, 0], sizes = [8, 384], strides = [1, 1]} : vector<8x512xf32> to vector<8x384xf32>
    %cst_35 = arith.constant 5.000000e-01 : f32
    %80 = vector.broadcast %cst_35 : f32 to vector<8x384xf32>
    %81 = arith.mulf %80, %79 : vector<8x384xf32>
    %82 = math.tanh %81 : vector<8x384xf32>
    %cst_36 = arith.constant 1.000000e+00 : f32
    %83 = vector.broadcast %cst_36 : f32 to vector<8x384xf32>
    %84 = arith.addf %82, %83 : vector<8x384xf32>
    %cst_37 = arith.constant 5.000000e-01 : f32
    %85 = vector.broadcast %cst_37 : f32 to vector<8x384xf32>
    %86 = arith.mulf %85, %84 : vector<8x384xf32>
    %87 = vector.extract_strided_slice %78 {offsets = [0, 384], sizes = [8, 128], strides = [1, 1]} : vector<8x512xf32> to vector<8x128xf32>
    %88 = math.tanh %87 : vector<8x128xf32>
    %89 = vector.extract_strided_slice %86 {offsets = [0, 0], sizes = [8, 128], strides = [1, 1]} : vector<8x384xf32> to vector<8x128xf32>
    %90 = vector.extract_strided_slice %86 {offsets = [0, 128], sizes = [8, 128], strides = [1, 1]} : vector<8x384xf32> to vector<8x128xf32>
    %91 = vector.extract_strided_slice %86 {offsets = [0, 256], sizes = [8, 128], strides = [1, 1]} : vector<8x384xf32> to vector<8x128xf32>
    %92 = arith.mulf %90, %72 : vector<8x128xf32>
    %93 = arith.mulf %89, %88 : vector<8x128xf32>
    %94 = arith.addf %92, %93 : vector<8x128xf32>
    %95 = math.tanh %94 : vector<8x128xf32>
    %96 = arith.mulf %91, %95 : vector<8x128xf32>
    %c32 = arith.constant 32 : index
    %c0_38 = arith.constant 0 : index
    %97 = vector.load %arg7[%c32, %c0_38] : memref<64x512xf32, #tpu.memory_space<vmem>>, vector<8x512xf32>
    %c0_39 = arith.constant 0 : index
    %c0_40 = arith.constant 0 : index
    %98 = vector.load %arg3[%c0_39, %c0_40] : memref<128x512xf32, #tpu.memory_space<vmem>>, vector<128x512xf32>
    %cst_41 = arith.constant dense<0.000000e+00> : vector<8x512xf32>
    %99 = tpu.matmul %96, %98, %cst_41 {dimension_numbers = #tpu.dot_dimension_numbers<[1], [0], [0], [1], [0, 0, 1, 1], [], []>} : vector<8x128xf32>, vector<128x512xf32>, vector<8x512xf32> -> vector<8x512xf32>
    %100 = arith.addf %97, %99 : vector<8x512xf32>
    %101 = vector.extract_strided_slice %100 {offsets = [0, 0], sizes = [8, 384], strides = [1, 1]} : vector<8x512xf32> to vector<8x384xf32>
    %cst_42 = arith.constant 5.000000e-01 : f32
    %102 = vector.broadcast %cst_42 : f32 to vector<8x384xf32>
    %103 = arith.mulf %102, %101 : vector<8x384xf32>
    %104 = math.tanh %103 : vector<8x384xf32>
    %cst_43 = arith.constant 1.000000e+00 : f32
    %105 = vector.broadcast %cst_43 : f32 to vector<8x384xf32>
    %106 = arith.addf %104, %105 : vector<8x384xf32>
    %cst_44 = arith.constant 5.000000e-01 : f32
    %107 = vector.broadcast %cst_44 : f32 to vector<8x384xf32>
    %108 = arith.mulf %107, %106 : vector<8x384xf32>
    %109 = vector.extract_strided_slice %100 {offsets = [0, 384], sizes = [8, 128], strides = [1, 1]} : vector<8x512xf32> to vector<8x128xf32>
    %110 = math.tanh %109 : vector<8x128xf32>
    %111 = vector.extract_strided_slice %108 {offsets = [0, 0], sizes = [8, 128], strides = [1, 1]} : vector<8x384xf32> to vector<8x128xf32>
    %112 = vector.extract_strided_slice %108 {offsets = [0, 128], sizes = [8, 128], strides = [1, 1]} : vector<8x384xf32> to vector<8x128xf32>
    %113 = vector.extract_strided_slice %108 {offsets = [0, 256], sizes = [8, 128], strides = [1, 1]} : vector<8x384xf32> to vector<8x128xf32>
    %114 = arith.mulf %112, %94 : vector<8x128xf32>
    %115 = arith.mulf %111, %110 : vector<8x128xf32>
    %116 = arith.addf %114, %115 : vector<8x128xf32>
    %117 = math.tanh %116 : vector<8x128xf32>
    %118 = arith.mulf %113, %117 : vector<8x128xf32>
    %c40 = arith.constant 40 : index
    %c0_45 = arith.constant 0 : index
    %119 = vector.load %arg7[%c40, %c0_45] : memref<64x512xf32, #tpu.memory_space<vmem>>, vector<8x512xf32>
    %c0_46 = arith.constant 0 : index
    %c0_47 = arith.constant 0 : index
    %120 = vector.load %arg3[%c0_46, %c0_47] : memref<128x512xf32, #tpu.memory_space<vmem>>, vector<128x512xf32>
    %cst_48 = arith.constant dense<0.000000e+00> : vector<8x512xf32>
    %121 = tpu.matmul %118, %120, %cst_48 {dimension_numbers = #tpu.dot_dimension_numbers<[1], [0], [0], [1], [0, 0, 1, 1], [], []>} : vector<8x128xf32>, vector<128x512xf32>, vector<8x512xf32> -> vector<8x512xf32>
    %122 = arith.addf %119, %121 : vector<8x512xf32>
    %123 = vector.extract_strided_slice %122 {offsets = [0, 0], sizes = [8, 384], strides = [1, 1]} : vector<8x512xf32> to vector<8x384xf32>
    %cst_49 = arith.constant 5.000000e-01 : f32
    %124 = vector.broadcast %cst_49 : f32 to vector<8x384xf32>
    %125 = arith.mulf %124, %123 : vector<8x384xf32>
    %126 = math.tanh %125 : vector<8x384xf32>
    %cst_50 = arith.constant 1.000000e+00 : f32
    %127 = vector.broadcast %cst_50 : f32 to vector<8x384xf32>
    %128 = arith.addf %126, %127 : vector<8x384xf32>
    %cst_51 = arith.constant 5.000000e-01 : f32
    %129 = vector.broadcast %cst_51 : f32 to vector<8x384xf32>
    %130 = arith.mulf %129, %128 : vector<8x384xf32>
    %131 = vector.extract_strided_slice %122 {offsets = [0, 384], sizes = [8, 128], strides = [1, 1]} : vector<8x512xf32> to vector<8x128xf32>
    %132 = math.tanh %131 : vector<8x128xf32>
    %133 = vector.extract_strided_slice %130 {offsets = [0, 0], sizes = [8, 128], strides = [1, 1]} : vector<8x384xf32> to vector<8x128xf32>
    %134 = vector.extract_strided_slice %130 {offsets = [0, 128], sizes = [8, 128], strides = [1, 1]} : vector<8x384xf32> to vector<8x128xf32>
    %135 = vector.extract_strided_slice %130 {offsets = [0, 256], sizes = [8, 128], strides = [1, 1]} : vector<8x384xf32> to vector<8x128xf32>
    %136 = arith.mulf %134, %116 : vector<8x128xf32>
    %137 = arith.mulf %133, %132 : vector<8x128xf32>
    %138 = arith.addf %136, %137 : vector<8x128xf32>
    %139 = math.tanh %138 : vector<8x128xf32>
    %140 = arith.mulf %135, %139 : vector<8x128xf32>
    %c48 = arith.constant 48 : index
    %c0_52 = arith.constant 0 : index
    %141 = vector.load %arg7[%c48, %c0_52] : memref<64x512xf32, #tpu.memory_space<vmem>>, vector<8x512xf32>
    %c0_53 = arith.constant 0 : index
    %c0_54 = arith.constant 0 : index
    %142 = vector.load %arg3[%c0_53, %c0_54] : memref<128x512xf32, #tpu.memory_space<vmem>>, vector<128x512xf32>
    %cst_55 = arith.constant dense<0.000000e+00> : vector<8x512xf32>
    %143 = tpu.matmul %140, %142, %cst_55 {dimension_numbers = #tpu.dot_dimension_numbers<[1], [0], [0], [1], [0, 0, 1, 1], [], []>} : vector<8x128xf32>, vector<128x512xf32>, vector<8x512xf32> -> vector<8x512xf32>
    %144 = arith.addf %141, %143 : vector<8x512xf32>
    %145 = vector.extract_strided_slice %144 {offsets = [0, 0], sizes = [8, 384], strides = [1, 1]} : vector<8x512xf32> to vector<8x384xf32>
    %cst_56 = arith.constant 5.000000e-01 : f32
    %146 = vector.broadcast %cst_56 : f32 to vector<8x384xf32>
    %147 = arith.mulf %146, %145 : vector<8x384xf32>
    %148 = math.tanh %147 : vector<8x384xf32>
    %cst_57 = arith.constant 1.000000e+00 : f32
    %149 = vector.broadcast %cst_57 : f32 to vector<8x384xf32>
    %150 = arith.addf %148, %149 : vector<8x384xf32>
    %cst_58 = arith.constant 5.000000e-01 : f32
    %151 = vector.broadcast %cst_58 : f32 to vector<8x384xf32>
    %152 = arith.mulf %151, %150 : vector<8x384xf32>
    %153 = vector.extract_strided_slice %144 {offsets = [0, 384], sizes = [8, 128], strides = [1, 1]} : vector<8x512xf32> to vector<8x128xf32>
    %154 = math.tanh %153 : vector<8x128xf32>
    %155 = vector.extract_strided_slice %152 {offsets = [0, 0], sizes = [8, 128], strides = [1, 1]} : vector<8x384xf32> to vector<8x128xf32>
    %156 = vector.extract_strided_slice %152 {offsets = [0, 128], sizes = [8, 128], strides = [1, 1]} : vector<8x384xf32> to vector<8x128xf32>
    %157 = vector.extract_strided_slice %152 {offsets = [0, 256], sizes = [8, 128], strides = [1, 1]} : vector<8x384xf32> to vector<8x128xf32>
    %158 = arith.mulf %156, %138 : vector<8x128xf32>
    %159 = arith.mulf %155, %154 : vector<8x128xf32>
    %160 = arith.addf %158, %159 : vector<8x128xf32>
    %161 = math.tanh %160 : vector<8x128xf32>
    %162 = arith.mulf %157, %161 : vector<8x128xf32>
    %c56 = arith.constant 56 : index
    %c0_59 = arith.constant 0 : index
    %163 = vector.load %arg7[%c56, %c0_59] : memref<64x512xf32, #tpu.memory_space<vmem>>, vector<8x512xf32>
    %c0_60 = arith.constant 0 : index
    %c0_61 = arith.constant 0 : index
    %164 = vector.load %arg3[%c0_60, %c0_61] : memref<128x512xf32, #tpu.memory_space<vmem>>, vector<128x512xf32>
    %cst_62 = arith.constant dense<0.000000e+00> : vector<8x512xf32>
    %165 = tpu.matmul %162, %164, %cst_62 {dimension_numbers = #tpu.dot_dimension_numbers<[1], [0], [0], [1], [0, 0, 1, 1], [], []>} : vector<8x128xf32>, vector<128x512xf32>, vector<8x512xf32> -> vector<8x512xf32>
    %166 = arith.addf %163, %165 : vector<8x512xf32>
    %167 = vector.extract_strided_slice %166 {offsets = [0, 0], sizes = [8, 384], strides = [1, 1]} : vector<8x512xf32> to vector<8x384xf32>
    %cst_63 = arith.constant 5.000000e-01 : f32
    %168 = vector.broadcast %cst_63 : f32 to vector<8x384xf32>
    %169 = arith.mulf %168, %167 : vector<8x384xf32>
    %170 = math.tanh %169 : vector<8x384xf32>
    %cst_64 = arith.constant 1.000000e+00 : f32
    %171 = vector.broadcast %cst_64 : f32 to vector<8x384xf32>
    %172 = arith.addf %170, %171 : vector<8x384xf32>
    %cst_65 = arith.constant 5.000000e-01 : f32
    %173 = vector.broadcast %cst_65 : f32 to vector<8x384xf32>
    %174 = arith.mulf %173, %172 : vector<8x384xf32>
    %175 = vector.extract_strided_slice %166 {offsets = [0, 384], sizes = [8, 128], strides = [1, 1]} : vector<8x512xf32> to vector<8x128xf32>
    %176 = math.tanh %175 : vector<8x128xf32>
    %177 = vector.extract_strided_slice %174 {offsets = [0, 0], sizes = [8, 128], strides = [1, 1]} : vector<8x384xf32> to vector<8x128xf32>
    %178 = vector.extract_strided_slice %174 {offsets = [0, 128], sizes = [8, 128], strides = [1, 1]} : vector<8x384xf32> to vector<8x128xf32>
    %179 = vector.extract_strided_slice %174 {offsets = [0, 256], sizes = [8, 128], strides = [1, 1]} : vector<8x384xf32> to vector<8x128xf32>
    %180 = arith.mulf %178, %160 : vector<8x128xf32>
    %181 = arith.mulf %177, %176 : vector<8x128xf32>
    %182 = arith.addf %180, %181 : vector<8x128xf32>
    %183 = math.tanh %182 : vector<8x128xf32>
    %184 = arith.mulf %179, %183 : vector<8x128xf32>
    %c0_66 = arith.constant 0 : index
    %c0_67 = arith.constant 0 : index
    %185 = vector.load %arg4[%c0_66, %c0_67] : memref<128x128xf32, #tpu.memory_space<vmem>>, vector<128x128xf32>
    %cst_68 = arith.constant dense<0.000000e+00> : vector<8x128xf32>
    %186 = tpu.matmul %184, %185, %cst_68 {dimension_numbers = #tpu.dot_dimension_numbers<[1], [0], [0], [1], [0, 0, 1, 1], [], []>} : vector<8x128xf32>, vector<128x128xf32>, vector<8x128xf32> -> vector<8x128xf32>
    %c0_69 = arith.constant 0 : index
    %c0_70 = arith.constant 0 : index
    %187 = vector.load %arg5[%c0_69, %c0_70] : memref<1x128xf32, #tpu.memory_space<vmem>>, vector<1x128xf32>
    %188 = vector.broadcast %187 : vector<1x128xf32> to vector<8x128xf32>
    %189 = arith.addf %186, %188 : vector<8x128xf32>
    %c0_71 = arith.constant 0 : index
    %c0_72 = arith.constant 0 : index
    %190 = vector.load %arg6[%c0_71, %c0_72] : memref<8x128xf32, #tpu.memory_space<vmem>>, vector<8x128xf32>
    tpu.vector_store %arg6[%c0_71, %c0_72], %189 {strides = array<i32>} : memref<8x128xf32, #tpu.memory_space<vmem>>, vector<8x128xf32>,
    return
  }
}

</mosaic_0001>

<bundles_post_ra>
// kernel: lstm_model_forward.1
= control target key start
LH: loop header
LB: loop body
LE: loop exit
PB: predicated region body
PF: predicated region fallthrough
CT: control target
= control target key end

     0   :  { %11 = vsyncpa [#allocation4], 0  ;;  %s3214_s0 = inlined_call_operand.vmem [shape: f32[64,8], index: 0, kind: input, shape index: {}]   ;;  %s3215_s1 = inlined_call_operand.vmem [shape: f32[8,512], index: 1, kind: input, shape index: {}]   ;;  %s3216_s2 = inlined_call_operand.vmem [shape: f32[1,512], index: 2, kind: input, shape index: {}]   ;;  %s3217_s3 = inlined_call_operand.hbm [shape: f32[128,512], index: 3, kind: input, shape index: {}]   ;;  %s3218_s4 = inlined_call_operand.hbm [shape: f32[128,128], index: 4, kind: input, shape index: {}]   ;;  %s3219_s5 = inlined_call_operand.vmem [shape: f32[1,128], index: 5, kind: input, shape index: {}]   ;;  %s3220_s6 = inlined_call_operand.vmem [shape: f32[8,128], index: 6, kind: output, shape index: {}]  }
   0x1   :  { %12 = vsyncpa [#allocation6], 0  ;;  %s2141_s21 = smov [#allocation3]  }
   0x2   :  { %s24_s22 = sshll.u32 %s2141_s21, 4  ;;  %s25_s22 = int_to_ptr.vmem [resolvable:$true] %s24_s22 }
   0x3   :  { %s2105_s23 = scalar_lea.vmem %s25_s22, 8192  ;;  %p2110_p1 = scmp.lt.s32.totalorder %s25_s22, %s25_s22 }
   0x4   :  { %p2106_p0 = scmp.ne.s32.totalorder %s25_s22, %s2105_s23  ;;  %p2111_p2 = scmp.lt.s32.totalorder %s2105_s23, %s2105_s23 }
   0x6   :  { %p2112_p3 = por %p2111_p2, %p2110_p1 }
   0x8   :  { %p2113_p4 = pnand %p2112_p3, %p2106_p0 }
   0xa   :  { %2116 = shalt.err (!%p2113_p4)
}
   0xb   :  { %s2142_s24 = smov 512   ;;  %s2143_s25 = smov 32  }
   0xc   :  { %30 = dma.hbm_to_vmem [thread:$0]  %s3217_s3, 8192, %s25_s22, [#allocation4], %s2142_s24, %s2142_s24, %s2143_s25  }
   0xd   :  { %s2144_s28 = smov [#allocation5]  }
   0xe   :  { %s36_s29 = sshll.u32 %s2144_s28, 4  ;;  %s37_s29 = int_to_ptr.vmem [resolvable:$true] %s36_s29 }
   0xf   :  { %s2125_s30 = scalar_lea.vmem %s37_s29, 2048  ;;  %p2130_p6 = scmp.lt.s32.totalorder %s37_s29, %s37_s29 }
  0x10   :  { %p2126_p5 = scmp.ne.s32.totalorder %s37_s29, %s2125_s30  ;;  %p2131_p7 = scmp.lt.s32.totalorder %s2125_s30, %s2125_s30 }
  0x12   :  { %p2132_p8 = por %p2131_p7, %p2130_p6 }
  0x14   :  { %p2133_p9 = pnand %p2132_p8, %p2126_p5 }
  0x16   :  { %2136 = shalt.err (!%p2133_p9)
}
  0x17   :  { %s2145_s7 = smov 128   ;;  %s2146_s8 = smov 8  }
  0x18   :  { %42 = dma.hbm_to_vmem [thread:$0]  %s3218_s4, 2048, %s37_s29, [#allocation6], %s2145_s7, %s2145_s7, %s2146_s8  }
  0x19   :  { %2137 = dma.done.wait [#allocation4], 8192  }
  0x1a   :  { %2138 = vsyncadd [#allocation4], 4294959104 }
  0x1b   :  { %2139 = dma.done.wait [#allocation6], 2048  }
  0x1c   :  { %2140 = vsyncadd [#allocation6], 4294965248  ;;  %v3221_v0 = vmov 0.0   ;;  %v60_v1 = vld [vmem:[%s3215_s1 + $0x8] sm:$0xff]  ;;  %v62_v2 = vld [vmem:[%s3215_s1 + $0x18] sm:$0xff]  ;;  %vm85_vm0 = vcmask 64512  }
  0x1d   :  { %174 = vmatprep.mubr.f32.mxu0 %v3221_v0  ;;  %287 = vmatprep.mubr.f32.mxu1 %v3221_v0  ;;  %v59_v3 = vld [vmem:[%s3215_s1] sm:$0xff]  ;;  %v61_v4 = vld [vmem:[%s3215_s1 + $0x10] sm:$0xff]  ;;  %v2207_v6 = vld [vmem:[#allocation3 + $0x1e8] sm:$0xff]  ;;  %vm2148_vm1 = vmmov 0  }
  0x1e   :  { %140 = vmatprep.subr.mxu0 %v60_v1  ;;  %253 = vmatprep.subr.mxu1 %v62_v2  ;;  %v51_v5 = vld [vmem:[%s3214_s0] sm:$0xff]  ;;  %3313 = vst [vmem:[#allocation9_spill] sm:$0xff] %v2207_v6  ;;  %v2209_v7 = vld [vmem:[#allocation3 + $0x1f8] sm:$0xff]  ;;  %v2213_v9 = vld [vmem:[#allocation3 + $0x1f0] sm:$0xff] }
  0x1f   :  { %141 = vmatpush1.msra.mxu0 %v59_v3  ;;  %254 = vmatpush1.msra.mxu1 %v61_v4  ;;  %3314 = vst [vmem:[#allocation10_spill] sm:$0xff] %v2209_v7  ;;  %v2211_v8 = vld [vmem:[#allocation3 + $0x1e0] sm:$0xff]  ;;  %v2217_v10 = vld [vmem:[#allocation3 + $0x1c8] sm:$0xff]  ;;  %v2219_v11 = vld [vmem:[#allocation3 + $0x1d8] sm:$0xff] }
  0x20   :  { %1876 = vmatmul.mubr.msk.f32.vlgmr.msra.gmra.mxu0 %vm85_vm0, %v51_v5  ;;  %1884 = vmatmul.mubr.msk.f32.vlgmr.msra.gmra.mxu1 %vm85_vm0, %v51_v5  ;;  %v2225_v12 = vld [vmem:[#allocation3 + $0x1c0] sm:$0xff]  ;;  %v2227_v13 = vld [vmem:[#allocation3 + $0x1d0] sm:$0xff]  ;;  %v52_v14 = vld [vmem:[%s3214_s0 + $0x8] sm:$0xff] }
  0x21   :  { %436 = vmatprep.subr.mxu0 %v2207_v6  ;;  %507 = vmatprep.subr.mxu1 %v2209_v7  ;;  %v2236_v15 = vld [vmem:[#allocation3 + $0x1a8] sm:$0xff]  ;;  %v2238_v16 = vld [vmem:[#allocation3 + $0x1b8] sm:$0xff]  ;;  %v2242_v17 = vld [vmem:[#allocation3 + $0x1a0] sm:$0xff] }
  0x22   :  { %437 = vmatpush1.msra.mxu0 %v2211_v8  ;;  %508 = vmatpush1.msra.mxu1 %v2213_v9  ;;  %v2244_v18 = vld [vmem:[#allocation3 + $0x1b0] sm:$0xff]  ;;  %v2248_v19 = vld [vmem:[#allocation3 + $0x188] sm:$0xff]  ;;  %v2250_v20 = vld [vmem:[#allocation3 + $0x198] sm:$0xff] }
  0x23   :  { %438 = vmatprep.subr.mxu0 %v2217_v10  ;;  %509 = vmatprep.subr.mxu1 %v2219_v11  ;;  %v2256_v21 = vld [vmem:[#allocation3 + $0x180] sm:$0xff]  ;;  %v2258_v22 = vld [vmem:[#allocation3 + $0x190] sm:$0xff]  ;;  %v2267_v24 = vld [vmem:[#allocation3 + $0x168] sm:$0xff] }
  0x24   :  { %180 = vmatprep.mubr.f32.mxu0 %v3221_v0  ;;  %293 = vmatprep.mubr.f32.mxu1 %v3221_v0  ;;  %v53_v23 = vld [vmem:[%s3214_s0 + $0x10] sm:$0xff]  ;;  %v2269_v25 = vld [vmem:[#allocation3 + $0x178] sm:$0xff]  ;;  %v2273_v26 = vld [vmem:[#allocation3 + $0x160] sm:$0xff] }
  0x25   :  { %439 = vmatpush1.msra.mxu0 %v2225_v12  ;;  %510 = vmatpush1.msra.mxu1 %v2227_v13  ;;  %v2275_v27 = vld [vmem:[#allocation3 + $0x170] sm:$0xff]  ;;  %v2279_v28 = vld [vmem:[#allocation3 + $0x148] sm:$0xff]  ;;  %v2281_v29 = vld [vmem:[#allocation3 + $0x158] sm:$0xff] }
  0x26   :  { %1877 = vmatmul.mubr.msk.f32.gmra.mxu0 %vm85_vm0, %v52_v14  ;;  %1885 = vmatmul.mubr.msk.f32.gmra.mxu1 %vm85_vm0, %v52_v14  ;;  %v2287_v30 = vld [vmem:[#allocation3 + $0x140] sm:$0xff]  ;;  %v2289_v31 = vld [vmem:[#allocation3 + $0x150] sm:$0xff]  ;;  %v54_v32 = vld [vmem:[%s3214_s0 + $0x18] sm:$0xff] }
  0x27   :  { %440 = vmatprep.subr.mxu0 %v2236_v15  ;;  %511 = vmatprep.subr.mxu1 %v2238_v16  ;;  %v2298_v33 = vld [vmem:[#allocation3 + $0x128] sm:$0xff]  ;;  %v2300_v34 = vld [vmem:[#allocation3 + $0x138] sm:$0xff]  ;;  %v2304_v35 = vld [vmem:[#allocation3 + $0x120] sm:$0xff] }
  0x28   :  { %441 = vmatpush1.msra.mxu0 %v2242_v17  ;;  %512 = vmatpush1.msra.mxu1 %v2244_v18  ;;  %v2306_v36 = vld [vmem:[#allocation3 + $0x130] sm:$0xff]  ;;  %v2310_v37 = vld [vmem:[#allocation3 + $0x108] sm:$0xff]  ;;  %v2312_v38 = vld [vmem:[#allocation3 + $0x118] sm:$0xff] }
  0x29   :  { %442 = vmatprep.subr.mxu0 %v2248_v19  ;;  %513 = vmatprep.subr.mxu1 %v2250_v20  ;;  %v2318_v39 = vld [vmem:[#allocation3 + $0x100] sm:$0xff]  ;;  %v2320_v40 = vld [vmem:[#allocation3 + $0x110] sm:$0xff]  ;;  %v2329_v42 = vld [vmem:[#allocation3 + $0xe8] sm:$0xff] }
  0x2a   :  { %186 = vmatprep.mubr.f32.mxu0 %v3221_v0  ;;  %299 = vmatprep.mubr.f32.mxu1 %v3221_v0  ;;  %v55_v41 = vld [vmem:[%s3214_s0 + $0x20] sm:$0xff]  ;;  %v2331_v43 = vld [vmem:[#allocation3 + $0xf8] sm:$0xff]  ;;  %v2337_v45 = vld [vmem:[#allocation3 + $0xf0] sm:$0xff] }
  0x2b   :  { %443 = vmatpush1.msra.mxu0 %v2256_v21  ;;  %514 = vmatpush1.msra.mxu1 %v2258_v22  ;;  %v2335_v44 = vld [vmem:[#allocation3 + $0xe0] sm:$0xff]  ;;  %v2341_v46 = vld [vmem:[#allocation3 + $0xc8] sm:$0xff]  ;;  %v2343_v47 = vld [vmem:[#allocation3 + $0xd8] sm:$0xff] }
  0x2c   :  { %1878 = vmatmul.mubr.msk.f32.gmra.mxu0 %vm85_vm0, %v53_v23  ;;  %1886 = vmatmul.mubr.msk.f32.gmra.mxu1 %vm85_vm0, %v53_v23  ;;  %v2349_v48 = vld [vmem:[#allocation3 + $0xc0] sm:$0xff]  ;;  %v2351_v49 = vld [vmem:[#allocation3 + $0xd0] sm:$0xff]  ;;  %v56_v50 = vld [vmem:[%s3214_s0 + $0x28] sm:$0xff] }
  0x2d   :  { %444 = vmatprep.subr.mxu0 %v2267_v24  ;;  %515 = vmatprep.subr.mxu1 %v2269_v25  ;;  %v2360_v51 = vld [vmem:[#allocation3 + $0xa8] sm:$0xff]  ;;  %v2362_v52 = vld [vmem:[#allocation3 + $0xb8] sm:$0xff]  ;;  %v2366_v53 = vld [vmem:[#allocation3 + $0xa0] sm:$0xff] }
  0x2e   :  { %445 = vmatpush1.msra.mxu0 %v2273_v26  ;;  %516 = vmatpush1.msra.mxu1 %v2275_v27  ;;  %v2368_v54 = vld [vmem:[#allocation3 + $0xb0] sm:$0xff]  ;;  %v2372_v55 = vld [vmem:[#allocation3 + $0x88] sm:$0xff]  ;;  %v2374_v56 = vld [vmem:[#allocation3 + $0x98] sm:$0xff] }
  0x2f   :  { %446 = vmatprep.subr.mxu0 %v2279_v28  ;;  %517 = vmatprep.subr.mxu1 %v2281_v29  ;;  %3315 = vst [vmem:[#allocation11_spill] sm:$0xff] %v2368_v54  ;;  %3316 = vst [vmem:[#allocation12_spill] sm:$0xff] %v2372_v55  ;;  %v2380_v57 = vld [vmem:[#allocation3 + $0x80] sm:$0xff]  ;;  %v2382_v58 = vld [vmem:[#allocation3 + $0x90] sm:$0xff] }
  0x30   :  { %192 = vmatprep.mubr.f32.mxu0 %v3221_v0  ;;  %305 = vmatprep.mubr.f32.mxu1 %v3221_v0  ;;  %3317 = vst [vmem:[#allocation13_spill] sm:$0xff] %v2374_v56  ;;  %3318 = vst [vmem:[#allocation14_spill] sm:$0xff] %v2380_v57  ;;  %v57_v59 = vld [vmem:[%s3214_s0 + $0x30] sm:$0xff]  ;;  %v2391_v60 = vld [vmem:[#allocation3 + $0x68] sm:$0xff] }
  0x31   :  { %447 = vmatpush1.msra.mxu0 %v2287_v30  ;;  %518 = vmatpush1.msra.mxu1 %v2289_v31  ;;  %3319 = vst [vmem:[#allocation15_spill] sm:$0xff] %v2382_v58  ;;  %3320 = vst [vmem:[#allocation16_spill] sm:$0xff] %v2391_v60  ;;  %v2393_v61 = vld [vmem:[#allocation3 + $0x78] sm:$0xff]  ;;  %v2397_v62 = vld [vmem:[#allocation3 + $0x60] sm:$0xff] }
  0x32   :  { %1879 = vmatmul.mubr.msk.f32.gmra.mxu0 %vm85_vm0, %v54_v32  ;;  %1887 = vmatmul.mubr.msk.f32.gmra.mxu1 %vm85_vm0, %v54_v32  ;;  %3321 = vst [vmem:[#allocation17_spill] sm:$0xff] %v2393_v61  ;;  %3322 = vst [vmem:[#allocation18_spill] sm:$0xff] %v2397_v62  ;;  %v2399_v63 = vld [vmem:[#allocation3 + $0x70] sm:$0xff]  ;;  %v2403_v1 = vld [vmem:[#allocation3 + $0x48] sm:$0xff] }
  0x33   :  { %448 = vmatprep.subr.mxu0 %v2298_v33  ;;  %519 = vmatprep.subr.mxu1 %v2300_v34  ;;  %3323 = vst [vmem:[#allocation19_spill] sm:$0xff] %v2399_v63  ;;  %3324 = vst [vmem:[#allocation20_spill] sm:$0xff] %v2403_v1  ;;  %v2405_v2 = vld [vmem:[#allocation3 + $0x58] sm:$0xff]  ;;  %v2411_v3 = vld [vmem:[#allocation3 + $0x40] sm:$0xff] }
  0x34   :  { %449 = vmatpush1.msra.mxu0 %v2304_v35  ;;  %520 = vmatpush1.msra.mxu1 %v2306_v36  ;;  %3325 = vst [vmem:[#allocation21_spill] sm:$0xff] %v2405_v2  ;;  %3326 = vst [vmem:[#allocation22_spill] sm:$0xff] %v2411_v3  ;;  %v2413_v4 = vld [vmem:[#allocation3 + $0x50] sm:$0xff]  ;;  %v58_v5 = vld [vmem:[%s3214_s0 + $0x38] sm:$0xff] }
  0x35   :  { %450 = vmatprep.subr.mxu0 %v2310_v37  ;;  %521 = vmatprep.subr.mxu1 %v2312_v38  ;;  %3327 = vst [vmem:[#allocation23_spill] sm:$0xff] %v2413_v4  ;;  %v2422_v14 = vld [vmem:[#allocation3 + $0x28] sm:$0xff]  ;;  %v2424_v23 = vld [vmem:[#allocation3 + $0x38] sm:$0xff]  ;;  %v2428_v32 = vld [vmem:[#allocation3 + $0x20] sm:$0xff] }
  0x36   :  { %198 = vmatprep.mubr.f32.mxu0 %v3221_v0  ;;  %311 = vmatprep.mubr.f32.mxu1 %v3221_v0  ;;  %3328 = vst [vmem:[#allocation24_spill] sm:$0xff] %v2422_v14  ;;  %3329 = vst [vmem:[#allocation25_spill] sm:$0xff] %v2424_v23 }
  0x37   :  { %451 = vmatpush1.msra.mxu0 %v2318_v39  ;;  %522 = vmatpush1.msra.mxu1 %v2320_v40  ;;  %3330 = vst [vmem:[#allocation26_spill] sm:$0xff] %v2428_v32 }
  0x38   :  { %1880 = vmatmul.mubr.msk.f32.gmra.mxu0 %vm85_vm0, %v55_v41  ;;  %1888 = vmatmul.mubr.msk.f32.gmra.mxu1 %vm85_vm0, %v55_v41  ;;  %v2430_v41 = vld [vmem:[#allocation3 + $0x30] sm:$0xff] }
  0x39   :  { %452 = vmatprep.subr.mxu0 %v2329_v42  ;;  %523 = vmatprep.subr.mxu1 %v2331_v43  ;;  %3331 = vst [vmem:[#allocation27_spill] sm:$0xff] %v2430_v41 }
  0x3a   :  { %453 = vmatpush1.msra.mxu0 %v2335_v44  ;;  %524 = vmatpush1.msra.mxu1 %v2337_v45 }
  0x3b   :  { %454 = vmatprep.subr.mxu0 %v2341_v46  ;;  %525 = vmatprep.subr.mxu1 %v2343_v47 }
  0x3c   :  { %204 = vmatprep.mubr.f32.mxu0 %v3221_v0  ;;  %317 = vmatprep.mubr.f32.mxu1 %v3221_v0 }
  0x3d   :  { %455 = vmatpush1.msra.mxu0 %v2349_v48  ;;  %526 = vmatpush1.msra.mxu1 %v2351_v49 }
  0x3e   :  { %1881 = vmatmul.mubr.msk.f32.gmra.mxu0 %vm85_vm0, %v56_v50  ;;  %1889 = vmatmul.mubr.msk.f32.gmra.mxu1 %vm85_vm0, %v56_v50  ;;  %v2434_v50 = vld [vmem:[#allocation3 + $0x8] sm:$0xff] }
  0x3f   :  { %456 = vmatprep.subr.mxu0 %v2360_v51  ;;  %527 = vmatprep.subr.mxu1 %v2362_v52  ;;  %3332 = vst [vmem:[#allocation28_spill] sm:$0xff] %v2434_v50 }
  0x40   :  { %457 = vmatpush1.msra.mxu0 %v2366_v53  ;;  %528 = vmatpush1.msra.mxu1 %v2368_v54 }
  0x41   :  { %458 = vmatprep.subr.mxu0 %v2372_v55  ;;  %529 = vmatprep.subr.mxu1 %v2374_v56 }
  0x42   :  { %210 = vmatprep.mubr.f32.mxu0 %v3221_v0  ;;  %323 = vmatprep.mubr.f32.mxu1 %v3221_v0 }
  0x43   :  { %459 = vmatpush1.msra.mxu0 %v2380_v57  ;;  %530 = vmatpush1.msra.mxu1 %v2382_v58 }
  0x44   :  { %1882 = vmatmul.mubr.msk.f32.gmra.mxu0 %vm85_vm0, %v57_v59  ;;  %1890 = vmatmul.mubr.msk.f32.gmra.mxu1 %vm85_vm0, %v57_v59  ;;  %v2436_v59 = vld [vmem:[#allocation3 + $0x18] sm:$0xff] }
  0x45   :  { %460 = vmatprep.subr.mxu0 %v2391_v60  ;;  %531 = vmatprep.subr.mxu1 %v2393_v61  ;;  %3333 = vst [vmem:[#allocation29_spill] sm:$0xff] %v2436_v59 }
  0x46   :  { %461 = vmatpush1.msra.mxu0 %v2397_v62  ;;  %532 = vmatpush1.msra.mxu1 %v2399_v63 }
  0x47   :  { %462 = vmatprep.subr.mxu0 %v2403_v1  ;;  %533 = vmatprep.subr.mxu1 %v2405_v2 }
  0x48   :  { %216 = vmatprep.mubr.f32.mxu0 %v3221_v0  ;;  %329 = vmatprep.mubr.f32.mxu1 %v3221_v0  ;;  %v2440_v0 = vld [vmem:[#allocation3] sm:$0xff] }
  0x49   :  { %463 = vmatpush1.msra.mxu0 %v2411_v3  ;;  %534 = vmatpush1.msra.mxu1 %v2413_v4  ;;  %3334 = vst [vmem:[#allocation30_spill] sm:$0xff] %v2440_v0  ;;  %v2444_v4 = vld [vmem:[#allocation3 + $0x10] sm:$0xff] }
  0x4a   :  { %1883 = vmatmul.mubr.msk.f32.gmra.mxu0 %vm85_vm0, %v58_v5  ;;  %1891 = vmatmul.mubr.msk.f32.gmra.mxu1 %vm85_vm0, %v58_v5  ;;  %3335 = vst [vmem:[#allocation31_spill] sm:$0xff] %v2444_v4  ;;  %v3336_v5 = vmov 0.0  }
  0x4b   :  { %464 = vmatprep.subr.mxu0 %v2422_v14  ;;  %535 = vmatprep.subr.mxu1 %v2424_v23 }
  0x4c   :  { %465 = vmatpush1.msra.mxu0 %v2428_v32  ;;  %536 = vmatpush1.msra.mxu1 %v2430_v41 }
  0x4d   :  { %466 = vmatprep.subr.mxu0 %v2434_v50  ;;  %537 = vmatprep.subr.mxu1 %v2436_v59 }
  0x4e   :  { %467 = vmatpush1.msra.mxu0 %v2440_v0  ;;  %500 = vmatprep.mubr.f32.mxu0 %v3336_v5 }
  0x4f   :  { %538 = vmatpush1.msra.mxu1 %v2444_v4  ;;  %571 = vmatprep.mubr.f32.mxu1 %v3336_v5 }
  0x50   :  { %501 = vmatmul.mubr.f32.vlgmr.msra.gmra.mxu0 %v3336_v5  ;;  %572 = vmatmul.mubr.f32.vlgmr.msra.gmra.mxu1 %v3336_v5 }
  0x51   :  { %604 = vmatprep.subr.mxu0 %v2207_v6  ;;  %675 = vmatprep.subr.mxu1 %v2209_v7 }
  0x52   :  { %605 = vmatpush1.msra.mxu0 %v2211_v8  ;;  %676 = vmatpush1.msra.mxu1 %v2213_v9 }
  0x53   :  { %606 = vmatprep.subr.mxu0 %v2217_v10  ;;  %677 = vmatprep.subr.mxu1 %v2219_v11 }
  0x54   :  { %607 = vmatpush1.msra.mxu0 %v2225_v12  ;;  %678 = vmatpush1.msra.mxu1 %v2227_v13 }
  0x55   :  { %608 = vmatprep.subr.mxu0 %v2236_v15  ;;  %679 = vmatprep.subr.mxu1 %v2238_v16 }
  0x56   :  { %609 = vmatpush1.msra.mxu0 %v2242_v17  ;;  %680 = vmatpush1.msra.mxu1 %v2244_v18 }
  0x57   :  { %610 = vmatprep.subr.mxu0 %v2248_v19  ;;  %681 = vmatprep.subr.mxu1 %v2250_v20 }
  0x58   :  { %611 = vmatpush1.msra.mxu0 %v2256_v21  ;;  %682 = vmatpush1.msra.mxu1 %v2258_v22 }
  0x59   :  { %612 = vmatprep.subr.mxu0 %v2267_v24  ;;  %683 = vmatprep.subr.mxu1 %v2269_v25 }
  0x5a   :  { %613 = vmatpush1.msra.mxu0 %v2273_v26  ;;  %684 = vmatpush1.msra.mxu1 %v2275_v27 }
  0x5b   :  { %614 = vmatprep.subr.mxu0 %v2279_v28  ;;  %685 = vmatprep.subr.mxu1 %v2281_v29 }
  0x5c   :  { %615 = vmatpush1.msra.mxu0 %v2287_v30  ;;  %686 = vmatpush1.msra.mxu1 %v2289_v31 }
  0x5d   :  { %616 = vmatprep.subr.mxu0 %v2298_v33  ;;  %687 = vmatprep.subr.mxu1 %v2300_v34 }
  0x5e   :  { %617 = vmatpush1.msra.mxu0 %v2304_v35  ;;  %688 = vmatpush1.msra.mxu1 %v2306_v36 }
  0x5f   :  { %618 = vmatprep.subr.mxu0 %v2310_v37  ;;  %689 = vmatprep.subr.mxu1 %v2312_v38 }
  0x60   :  { %619 = vmatpush1.msra.mxu0 %v2318_v39  ;;  %690 = vmatpush1.msra.mxu1 %v2320_v40 }
  0x61   :  { %620 = vmatprep.subr.mxu0 %v2329_v42  ;;  %691 = vmatprep.subr.mxu1 %v2331_v43 }
  0x62   :  { %621 = vmatpush1.msra.mxu0 %v2335_v44  ;;  %692 = vmatpush1.msra.mxu1 %v2337_v45 }
  0x63   :  { %622 = vmatprep.subr.mxu0 %v2341_v46  ;;  %693 = vmatprep.subr.mxu1 %v2343_v47 }
  0x64   :  { %623 = vmatpush1.msra.mxu0 %v2349_v48  ;;  %694 = vmatpush1.msra.mxu1 %v2351_v49 }
  0x65   :  { %624 = vmatprep.subr.mxu0 %v2360_v51  ;;  %695 = vmatprep.subr.mxu1 %v2362_v52 }
  0x66   :  { %625 = vmatpush1.msra.mxu0 %v2366_v53  ;;  %696 = vmatpush1.msra.mxu1 %v2368_v54 }
  0x67   :  { %626 = vmatprep.subr.mxu0 %v2372_v55  ;;  %697 = vmatprep.subr.mxu1 %v2374_v56  ;;  %v3337_v55 = vld [vmem:[#allocation23_spill] sm:$0xff] }
  0x68   :  { %627 = vmatpush1.msra.mxu0 %v2380_v57  ;;  %698 = vmatpush1.msra.mxu1 %v2382_v58 }
  0x69   :  { %628 = vmatprep.subr.mxu0 %v2391_v60  ;;  %699 = vmatprep.subr.mxu1 %v2393_v61 }
  0x6a   :  { %629 = vmatpush1.msra.mxu0 %v2397_v62  ;;  %700 = vmatpush1.msra.mxu1 %v2399_v63 }
  0x6b   :  { %630 = vmatprep.subr.mxu0 %v2403_v1  ;;  %701 = vmatprep.subr.mxu1 %v2405_v2 }
  0x6c   :  { %631 = vmatpush1.msra.mxu0 %v2411_v3  ;;  %702 = vmatpush1.msra.mxu1 %v3337_v55 }
  0x6d   :  { %632 = vmatprep.subr.mxu0 %v2422_v14  ;;  %703 = vmatprep.subr.mxu1 %v2424_v23  ;;  %v65_v23 = vlaneseq }
  0x6e   :  { %633 = vmatpush1.msra.mxu0 %v2428_v32  ;;  %704 = vmatpush1.msra.mxu1 %v2430_v41 }
  0x6f   :  { %634 = vmatprep.subr.mxu0 %v2434_v50  ;;  %705 = vmatprep.subr.mxu1 %v2436_v59  ;;  %v66_v32 = vshrl.u32 %v65_v23, 7 }
  0x70   :  { %635 = vmatpush1.msra.mxu0 %v2440_v0  ;;  %668 = vmatprep.mubr.f32.mxu0 %v3336_v5  ;;  %v63_v0 = vld [vmem:[%s3216_s2] sm:$0xf] }
  0x71   :  { %706 = vmatpush1.msra.mxu1 %v2444_v4  ;;  %739 = vmatprep.mubr.f32.mxu1 %v3336_v5  ;;  %v67_v50 = vsub.s32 0, %v66_v32  ;;  %v75_v59 = vsub.s32 2, %v66_v32  ;;  %v71_v5 = vsub.s32 1, %v66_v32 }
  0x72   :  { %772 = vmatprep.subr.mxu0 %v2207_v6  ;;  %843 = vmatprep.subr.mxu1 %v2209_v7  ;;  %v79_v6 = vsub.s32 3, %v66_v32 }
  0x73   :  { %v68_v3 = vrot.slane %v63_v0, %v67_v50  ;;  %v2533_v7 = vrot.slane %v63_v0, %v75_v59  ;;  %v72_v1 = vrot.slane %v63_v0, %v71_v5 }
  0x74   :  { %v2535_v63 = vrot.slane %v63_v0, %v79_v6 }
  0xe0   :  { %v2522_v14 = vpop.f32.mrf.mxu0  ;;  %v2524_v41 = vpop.f32.mrf.mxu1 }
  0xe2   :  { %v2529_v55 = vpop.f32.mrf.mxu0  ;;  %v2531_v4 = vpop.f32.mrf.mxu1 }
  0xe6   :  { %v182_v23 = vpop.f32.mrf.mxu0  ;;  %v295_v2 = vpop.f32.mrf.mxu1 }
  0xe7   :  { %v2537_v62 = vadd.f32 %v182_v23, %v68_v3  ;;  %v2540_v61 = vadd.f32 %v295_v2, %v2533_v7 }
  0xe8   :  { %v184_v60 = vpop.f32.mrf.mxu0  ;;  %v297_v58 = vpop.f32.mrf.mxu1 }
  0xe9   :  { %3338 = vst [vmem:[#allocation32_spill] sm:$0xff] %v2537_v62  ;;  %3339 = vst [vmem:[#allocation33_spill] sm:$0xff] %v2540_v61  ;;  %v2542_v57 = vadd.f32 %v184_v60, %v72_v1  ;;  %v2545_v56 = vadd.f32 %v297_v58, %v2535_v63 }
  0xeb   :  { %3340 = vst [vmem:[#allocation34_spill] sm:$0xff] %v2542_v57  ;;  %3341 = vst [vmem:[#allocation35_spill] sm:$0xff] %v2545_v56 }
  0xec   :  { %v188_v32 = vpop.f32.mrf.mxu0  ;;  %v301_v50 = vpop.f32.mrf.mxu1 }
  0xed   :  { %v2547_v59 = vadd.f32 %v188_v32, %v68_v3  ;;  %v2550_v5 = vadd.f32 %v301_v50, %v2533_v7 }
  0xee   :  { %v190_v0 = vpop.f32.mrf.mxu0  ;;  %v303_v6 = vpop.f32.mrf.mxu1 }
  0xef   :  { %3342 = vst [vmem:[#allocation36_spill] sm:$0xff] %v2547_v59  ;;  %3343 = vst [vmem:[#allocation37_spill] sm:$0xff] %v2550_v5  ;;  %v2552_v23 = vadd.f32 %v190_v0, %v72_v1  ;;  %v2555_v2 = vadd.f32 %v303_v6, %v2535_v63 }
  0xf1   :  { %3344 = vst [vmem:[#allocation38_spill] sm:$0xff] %v2552_v23  ;;  %3345 = vst [vmem:[#allocation39_spill] sm:$0xff] %v2555_v2 }
  0xf2   :  { %v194_v61 = vpop.f32.mrf.mxu0  ;;  %v307_v60 = vpop.f32.mrf.mxu1 }
  0xf3   :  { %v2557_v57 = vadd.f32 %v194_v61, %v68_v3  ;;  %v2560_v58 = vadd.f32 %v307_v60, %v2533_v7 }
  0xf4   :  { %v196_v56 = vpop.f32.mrf.mxu0  ;;  %v309_v32 = vpop.f32.mrf.mxu1 }
  0xf5   :  { %3346 = vst [vmem:[#allocation40_spill] sm:$0xff] %v2557_v57  ;;  %3347 = vst [vmem:[#allocation41_spill] sm:$0xff] %v2560_v58  ;;  %v2562_v59 = vadd.f32 %v196_v56, %v72_v1  ;;  %v2565_v50 = vadd.f32 %v309_v32, %v2535_v63 }
  0xf7   :  { %3348 = vst [vmem:[#allocation42_spill] sm:$0xff] %v2562_v59  ;;  %3349 = vst [vmem:[#allocation43_spill] sm:$0xff] %v2565_v50 }
  0xf8   :  { %v200_v5 = vpop.f32.mrf.mxu0  ;;  %v313_v0 = vpop.f32.mrf.mxu1 }
  0xf9   :  { %v2567_v23 = vadd.f32 %v200_v5, %v68_v3  ;;  %v2570_v6 = vadd.f32 %v313_v0, %v2533_v7 }
  0xfa   :  { %v202_v2 = vpop.f32.mrf.mxu0  ;;  %v315_v61 = vpop.f32.mrf.mxu1 }
  0xfb   :  { %3350 = vst [vmem:[#allocation44_spill] sm:$0xff] %v2567_v23  ;;  %3351 = vst [vmem:[#allocation45_spill] sm:$0xff] %v2570_v6  ;;  %v2572_v57 = vadd.f32 %v202_v2, %v72_v1  ;;  %v2575_v60 = vadd.f32 %v315_v61, %v2535_v63 }
  0xfd   :  { %3352 = vst [vmem:[#allocation46_spill] sm:$0xff] %v2572_v57  ;;  %3353 = vst [vmem:[#allocation47_spill] sm:$0xff] %v2575_v60 }
  0xfe   :  { %v206_v58 = vpop.f32.mrf.mxu0  ;;  %v319_v56 = vpop.f32.mrf.mxu1 }
  0xff   :  { %v2577_v59 = vadd.f32 %v206_v58, %v68_v3  ;;  %v2580_v32 = vadd.f32 %v319_v56, %v2533_v7 }
 0x100   :  { %v208_v50 = vpop.f32.mrf.mxu0  ;;  %v321_v5 = vpop.f32.mrf.mxu1 }
 0x101   :  { %3354 = vst [vmem:[#allocation48_spill] sm:$0xff] %v2577_v59  ;;  %3355 = vst [vmem:[#allocation49_spill] sm:$0xff] %v2580_v32  ;;  %v2582_v23 = vadd.f32 %v208_v50, %v72_v1  ;;  %v2585_v0 = vadd.f32 %v321_v5, %v2535_v63 }
 0x103   :  { %3356 = vst [vmem:[#allocation50_spill] sm:$0xff] %v2582_v23  ;;  %3357 = vst [vmem:[#allocation51_spill] sm:$0xff] %v2585_v0 }
 0x104   :  { %v212_v6 = vpop.f32.mrf.mxu0  ;;  %v325_v2 = vpop.f32.mrf.mxu1 }
 0x105   :  { %v2587_v57 = vadd.f32 %v212_v6, %v68_v3  ;;  %v2590_v61 = vadd.f32 %v325_v2, %v2533_v7 }
 0x106   :  { %v214_v60 = vpop.f32.mrf.mxu0  ;;  %v327_v58 = vpop.f32.mrf.mxu1 }
 0x107   :  { %3358 = vst [vmem:[#allocation52_spill] sm:$0xff] %v2587_v57  ;;  %3359 = vst [vmem:[#allocation53_spill] sm:$0xff] %v2590_v61  ;;  %v2592_v59 = vadd.f32 %v214_v60, %v72_v1  ;;  %v2595_v56 = vadd.f32 %v327_v58, %v2535_v63  ;;  %v177_v60 = vadd.f32 %v2522_v14, %v68_v3 }
 0x108   :  { %v179_v58 = vadd.f32 %v2529_v55, %v72_v1 }
 0x109   :  { %3360 = vst [vmem:[#allocation54_spill] sm:$0xff] %v2592_v59  ;;  %3361 = vst [vmem:[#allocation55_spill] sm:$0xff] %v2595_v56 }
 0x10a   :  { %v218_v32 = vpop.f32.mrf.mxu0  ;;  %v331_v50 = vpop.f32.mrf.mxu1 }
 0x10b   :  { %v2597_v23 = vadd.f32 %v218_v32, %v68_v3  ;;  %v2600_v5 = vadd.f32 %v331_v50, %v2533_v7  ;;  %v292_v50 = vadd.f32 %v2531_v4, %v2535_v63 }
 0x10c   :  { %v220_v0 = vpop.f32.mrf.mxu0  ;;  %v333_v6 = vpop.f32.mrf.mxu1 }
 0x10d   :  { %3362 = vst [vmem:[#allocation56_spill] sm:$0xff] %v2597_v23  ;;  %3363 = vst [vmem:[#allocation57_spill] sm:$0xff] %v2600_v5  ;;  %v2602_v57 = vadd.f32 %v220_v0, %v72_v1  ;;  %v2605_v2 = vadd.f32 %v333_v6, %v2535_v63  ;;  %v290_v6 = vadd.f32 %v2524_v41, %v2533_v7 }
 0x10f   :  { %3364 = vst [vmem:[#allocation58_spill] sm:$0xff] %v2602_v57  ;;  %3365 = vst [vmem:[#allocation59_spill] sm:$0xff] %v2605_v2  ;;  %v3387_v57 = vld [vmem:[#allocation31_spill] sm:$0xff] }
 0x110   :  { %v502_v61 = vpop.f32.mrf.mxu0  ;;  %v573_v59 = vpop.f32.mrf.mxu1 }
 0x111   :  { %v578_v56 = vadd.f32 %v502_v61, %v177_v60  ;;  %v580_v3 = vadd.f32 %v573_v59, %v290_v6  ;;  %v3371_v6 = vld [vmem:[#allocation16_spill] sm:$0xff] }
 0x112   :  { %v504_v62 = vpop.f32.mrf.mxu0  ;;  %v575_v54 = vpop.f32.mrf.mxu1 }
 0x113   :  { %v582_v32 = vmul.f32 0.5, %v578_v56  ;;  %v579_v23 = vadd.f32 %v504_v62, %v179_v58  ;;  %v581_v5 = vadd.f32 %v575_v54, %v292_v50  ;;  %v584_v14 = vmul.f32 0.5, %v580_v3  ;;  %v3369_v50 = vld [vmem:[#allocation14_spill] sm:$0xff]  ;;  %v3372_v3 = vld [vmem:[#allocation17_spill] sm:$0xff] }
 0x115   :  { %1953 = vtanh.f32 %v582_v32  ;;  %v583_v0 = vmul.f32 0.5, %v579_v23  ;;  %v3368_v32 = vld [vmem:[#allocation13_spill] sm:$0xff] }
 0x117   :  { %1955 = vtanh.f32 %v583_v0  ;;  %v3370_v0 = vld [vmem:[#allocation15_spill] sm:$0xff] }
 0x118   :  { %1957 = vtanh.f32 %v581_v5  ;;  %v3366_v5 = vld [vmem:[#allocation11_spill] sm:$0xff] }
 0x119   :  { %1959 = vtanh.f32 %v584_v14  ;;  %v3373_v14 = vld [vmem:[#allocation18_spill] sm:$0xff] }
 0x122   :  { %v1954_v2 = vpop.eup %1953 }
 0x123   :  { %v588_v55 = vadd.f32 1.0, %v1954_v2  ;;  %v3367_v2 = vld [vmem:[#allocation12_spill] sm:$0xff] }
 0x124   :  { %v1956_v1 = vpop.eup %1955 }
 0x125   :  { %v591_v61 = vmul.f32 0.5, %v588_v55  ;;  %v589_v62 = vadd.f32 1.0, %v1956_v1  ;;  %v1958_v60 = vpop.eup %1957  ;;  %v3374_v55 = vld [vmem:[#allocation19_spill] sm:$0xff]  ;;  %v3375_v1 = vld [vmem:[#allocation20_spill] sm:$0xff] }
 0x126   :  { %v1960_v54 = vpop.eup %1959 }
 0x127   :  { %v592_v56 = vmul.f32 0.5, %v589_v62  ;;  %v596_v63 = vmul.f32 %v1958_v60, %v591_v61  ;;  %v590_v23 = vadd.f32 1.0, %v1960_v54  ;;  %v3376_v61 = vld [vmem:[#allocation21_spill] sm:$0xff]  ;;  %v3377_v62 = vld [vmem:[#allocation22_spill] sm:$0xff]  ;;  %v3379_v60 = vld [vmem:[#allocation24_spill] sm:$0xff] }
 0x128   :  { %v3382_v54 = vld [vmem:[#allocation27_spill] sm:$0xff] }
 0x129   :  { %v595_v58 = vmul.f32 0.0, %v592_v56  ;;  %v593_v7 = vmul.f32 0.5, %v590_v23  ;;  %v3378_v56 = vld [vmem:[#allocation23_spill] sm:$0xff]  ;;  %v3383_v23 = vld [vmem:[#allocation28_spill] sm:$0xff] }
 0x12b   :  { %v2613_v4 = vadd.f32 %v596_v63, %v595_v58  ;;  %v3380_v58 = vld [vmem:[#allocation25_spill] sm:$0xff]  ;;  %v3381_v63 = vld [vmem:[#allocation26_spill] sm:$0xff] }
 0x12d   :  { %1961 = vtanh.f32 %v2613_v4 }
 0x13a   :  { %v1962_v41 = vpop.eup %1961 }
 0x13b   :  { %v599_v59 = vmul.f32 %v1962_v41, %v593_v7  ;;  %v3384_v7 = vld [vmem:[#allocation29_spill] sm:$0xff]  ;;  %v3385_v41 = vld [vmem:[#allocation30_spill] sm:$0xff] }
 0x13d   :  { %669 = vmatmul.mubr.f32.vlgmr.msra.gmra.mxu0 %v599_v59  ;;  %740 = vmatmul.mubr.f32.vlgmr.msra.gmra.mxu1 %v599_v59  ;;  %v3386_v59 = vmov 0.0  }
 0x13e   :  { %773 = vmatpush1.msra.mxu0 %v2211_v8  ;;  %844 = vmatpush1.msra.mxu1 %v2213_v9 }
 0x13f   :  { %774 = vmatprep.subr.mxu0 %v2217_v10  ;;  %845 = vmatprep.subr.mxu1 %v2219_v11 }
 0x140   :  { %775 = vmatpush1.msra.mxu0 %v2225_v12  ;;  %846 = vmatpush1.msra.mxu1 %v2227_v13 }
 0x141   :  { %776 = vmatprep.subr.mxu0 %v2236_v15  ;;  %847 = vmatprep.subr.mxu1 %v2238_v16 }
 0x142   :  { %777 = vmatpush1.msra.mxu0 %v2242_v17  ;;  %848 = vmatpush1.msra.mxu1 %v2244_v18 }
 0x143   :  { %778 = vmatprep.subr.mxu0 %v2248_v19  ;;  %849 = vmatprep.subr.mxu1 %v2250_v20 }
 0x144   :  { %779 = vmatpush1.msra.mxu0 %v2256_v21  ;;  %850 = vmatpush1.msra.mxu1 %v2258_v22 }
 0x145   :  { %780 = vmatprep.subr.mxu0 %v2267_v24  ;;  %851 = vmatprep.subr.mxu1 %v2269_v25 }
 0x146   :  { %781 = vmatpush1.msra.mxu0 %v2273_v26  ;;  %852 = vmatpush1.msra.mxu1 %v2275_v27 }
 0x147   :  { %782 = vmatprep.subr.mxu0 %v2279_v28  ;;  %853 = vmatprep.subr.mxu1 %v2281_v29 }
 0x148   :  { %783 = vmatpush1.msra.mxu0 %v2287_v30  ;;  %854 = vmatpush1.msra.mxu1 %v2289_v31 }
 0x149   :  { %784 = vmatprep.subr.mxu0 %v2298_v33  ;;  %855 = vmatprep.subr.mxu1 %v2300_v34 }
 0x14a   :  { %785 = vmatpush1.msra.mxu0 %v2304_v35  ;;  %856 = vmatpush1.msra.mxu1 %v2306_v36 }
 0x14b   :  { %786 = vmatprep.subr.mxu0 %v2310_v37  ;;  %857 = vmatprep.subr.mxu1 %v2312_v38 }
 0x14c   :  { %787 = vmatpush1.msra.mxu0 %v2318_v39  ;;  %858 = vmatpush1.msra.mxu1 %v2320_v40 }
 0x14d   :  { %788 = vmatprep.subr.mxu0 %v2329_v42  ;;  %859 = vmatprep.subr.mxu1 %v2331_v43 }
 0x14e   :  { %789 = vmatpush1.msra.mxu0 %v2335_v44  ;;  %860 = vmatpush1.msra.mxu1 %v2337_v45 }
 0x14f   :  { %790 = vmatprep.subr.mxu0 %v2341_v46  ;;  %861 = vmatprep.subr.mxu1 %v2343_v47 }
 0x150   :  { %791 = vmatpush1.msra.mxu0 %v2349_v48  ;;  %862 = vmatpush1.msra.mxu1 %v2351_v49 }
 0x151   :  { %792 = vmatprep.subr.mxu0 %v2360_v51  ;;  %863 = vmatprep.subr.mxu1 %v2362_v52 }
 0x152   :  { %793 = vmatpush1.msra.mxu0 %v2366_v53  ;;  %864 = vmatpush1.msra.mxu1 %v3366_v5 }
 0x153   :  { %794 = vmatprep.subr.mxu0 %v3367_v2  ;;  %865 = vmatprep.subr.mxu1 %v3368_v32 }
 0x154   :  { %795 = vmatpush1.msra.mxu0 %v3369_v50  ;;  %866 = vmatpush1.msra.mxu1 %v3370_v0 }
 0x155   :  { %796 = vmatprep.subr.mxu0 %v3371_v6  ;;  %867 = vmatprep.subr.mxu1 %v3372_v3 }
 0x156   :  { %797 = vmatpush1.msra.mxu0 %v3373_v14  ;;  %868 = vmatpush1.msra.mxu1 %v3374_v55  ;;  %v3392_v14 = vld [vmem:[#allocation35_spill] sm:$0xff] }
 0x157   :  { %798 = vmatprep.subr.mxu0 %v3375_v1  ;;  %869 = vmatprep.subr.mxu1 %v3376_v61 }
 0x158   :  { %799 = vmatpush1.msra.mxu0 %v3377_v62  ;;  %870 = vmatpush1.msra.mxu1 %v3378_v56  ;;  %v3388_v56 = vld [vmem:[#allocation9_spill] sm:$0xff]  ;;  %v3390_v62 = vld [vmem:[#allocation32_spill] sm:$0xff] }
 0x159   :  { %800 = vmatprep.subr.mxu0 %v3379_v60  ;;  %871 = vmatprep.subr.mxu1 %v3380_v58  ;;  %v3389_v60 = vld [vmem:[#allocation10_spill] sm:$0xff] }
 0x15a   :  { %801 = vmatpush1.msra.mxu0 %v3381_v63  ;;  %872 = vmatpush1.msra.mxu1 %v3382_v54 }
 0x15b   :  { %802 = vmatprep.subr.mxu0 %v3383_v23  ;;  %873 = vmatprep.subr.mxu1 %v3384_v7  ;;  %v3391_v7 = vld [vmem:[#allocation34_spill] sm:$0xff] }
 0x15c   :  { %803 = vmatpush1.msra.mxu0 %v3385_v41  ;;  %836 = vmatprep.mubr.f32.mxu0 %v3386_v59 }
 0x15d   :  { %874 = vmatpush1.msra.mxu1 %v3387_v57  ;;  %907 = vmatprep.mubr.f32.mxu1 %v3386_v59  ;;  %v3393_v57 = vld [vmem:[#allocation33_spill] sm:$0xff] }
 0x15e   :  { %940 = vmatprep.subr.mxu0 %v3388_v56  ;;  %1011 = vmatprep.subr.mxu1 %v3389_v60 }
 0x1fd   :  { %v670_v58 = vpop.f32.mrf.mxu0  ;;  %v741_v63 = vpop.f32.mrf.mxu1 }
 0x1fe   :  { %v746_v54 = vadd.f32 %v670_v58, %v3390_v62  ;;  %v748_v59 = vadd.f32 %v741_v63, %v3393_v57 }
 0x1ff   :  { %v672_v61 = vpop.f32.mrf.mxu0  ;;  %v743_v23 = vpop.f32.mrf.mxu1 }
 0x200   :  { %v750_v1 = vmul.f32 0.5, %v746_v54  ;;  %v747_v55 = vadd.f32 %v672_v61, %v3391_v7  ;;  %v749_v3 = vadd.f32 %v743_v23, %v3392_v14  ;;  %v752_v56 = vmul.f32 0.5, %v748_v59 }
 0x202   :  { %1963 = vtanh.f32 %v750_v1  ;;  %v751_v41 = vmul.f32 0.5, %v747_v55 }
 0x204   :  { %1965 = vtanh.f32 %v751_v41  ;;  %v3417_v41 = vld [vmem:[#allocation38_spill] sm:$0xff] }
 0x205   :  { %1967 = vtanh.f32 %v749_v3 }
 0x206   :  { %1969 = vtanh.f32 %v752_v56 }
 0x20f   :  { %v1964_v6 = vpop.eup %1963 }
 0x210   :  { %v756_v60 = vadd.f32 1.0, %v1964_v6  ;;  %v3416_v6 = vld [vmem:[#allocation36_spill] sm:$0xff] }
 0x211   :  { %v1966_v0 = vpop.eup %1965 }
 0x212   :  { %v759_v50 = vmul.f32 0.5, %v756_v60  ;;  %v757_v62 = vadd.f32 1.0, %v1966_v0  ;;  %v1968_v58 = vpop.eup %1967 }
 0x213   :  { %v1970_v14 = vpop.eup %1969 }
 0x214   :  { %v760_v32 = vmul.f32 0.5, %v757_v62  ;;  %v764_v54 = vmul.f32 %v1968_v58, %v759_v50  ;;  %v758_v3 = vadd.f32 1.0, %v1970_v14  ;;  %v3418_v58 = vld [vmem:[#allocation39_spill] sm:$0xff] }
 0x216   :  { %v763_v61 = vmul.f32 %v760_v32, %v2613_v4  ;;  %v761_v55 = vmul.f32 0.5, %v758_v3  ;;  %v3414_v4 = vld [vmem:[#allocation9_spill] sm:$0xff]  ;;  %v3415_v32 = vld [vmem:[#allocation10_spill] sm:$0xff] }
 0x218   :  { %v2687_v1 = vadd.f32 %v764_v54, %v763_v61  ;;  %v3419_v61 = vld [vmem:[#allocation37_spill] sm:$0xff] }
 0x21a   :  { %1971 = vtanh.f32 %v2687_v1 }
 0x227   :  { %v1972_v57 = vpop.eup %1971 }
 0x228   :  { %v767_v63 = vmul.f32 %v1972_v57, %v761_v55 }
 0x22a   :  { %837 = vmatmul.mubr.f32.vlgmr.msra.gmra.mxu0 %v767_v63  ;;  %908 = vmatmul.mubr.f32.vlgmr.msra.gmra.mxu1 %v767_v63 }
 0x22b   :  { %941 = vmatpush1.msra.mxu0 %v2211_v8  ;;  %1012 = vmatpush1.msra.mxu1 %v2213_v9  ;;  %v3394_v8 = vld [vmem:[#allocation13_spill] sm:$0xff]  ;;  %v3395_v9 = vld [vmem:[#allocation14_spill] sm:$0xff] }
 0x22c   :  { %942 = vmatprep.subr.mxu0 %v2217_v10  ;;  %1013 = vmatprep.subr.mxu1 %v2219_v11  ;;  %v3396_v10 = vld [vmem:[#allocation15_spill] sm:$0xff]  ;;  %v3397_v11 = vld [vmem:[#allocation16_spill] sm:$0xff] }
 0x22d   :  { %943 = vmatpush1.msra.mxu0 %v2225_v12  ;;  %1014 = vmatpush1.msra.mxu1 %v2227_v13  ;;  %v3398_v12 = vld [vmem:[#allocation17_spill] sm:$0xff]  ;;  %v3399_v13 = vld [vmem:[#allocation18_spill] sm:$0xff] }
 0x22e   :  { %944 = vmatprep.subr.mxu0 %v2236_v15  ;;  %1015 = vmatprep.subr.mxu1 %v2238_v16  ;;  %v3400_v15 = vld [vmem:[#allocation19_spill] sm:$0xff]  ;;  %v3401_v16 = vld [vmem:[#allocation20_spill] sm:$0xff] }
 0x22f   :  { %945 = vmatpush1.msra.mxu0 %v2242_v17  ;;  %1016 = vmatpush1.msra.mxu1 %v2244_v18  ;;  %v3402_v17 = vld [vmem:[#allocation21_spill] sm:$0xff]  ;;  %v3403_v18 = vld [vmem:[#allocation22_spill] sm:$0xff] }
 0x230   :  { %946 = vmatprep.subr.mxu0 %v2248_v19  ;;  %1017 = vmatprep.subr.mxu1 %v2250_v20  ;;  %v3404_v19 = vld [vmem:[#allocation23_spill] sm:$0xff]  ;;  %v3405_v20 = vld [vmem:[#allocation24_spill] sm:$0xff] }
 0x231   :  { %947 = vmatpush1.msra.mxu0 %v2256_v21  ;;  %1018 = vmatpush1.msra.mxu1 %v2258_v22  ;;  %v3406_v21 = vld [vmem:[#allocation25_spill] sm:$0xff]  ;;  %v3407_v22 = vld [vmem:[#allocation26_spill] sm:$0xff] }
 0x232   :  { %948 = vmatprep.subr.mxu0 %v2267_v24  ;;  %1019 = vmatprep.subr.mxu1 %v2269_v25  ;;  %v3408_v24 = vld [vmem:[#allocation27_spill] sm:$0xff]  ;;  %v3409_v25 = vld [vmem:[#allocation28_spill] sm:$0xff] }
 0x233   :  { %949 = vmatpush1.msra.mxu0 %v2273_v26  ;;  %1020 = vmatpush1.msra.mxu1 %v2275_v27  ;;  %v3410_v26 = vld [vmem:[#allocation29_spill] sm:$0xff]  ;;  %v3411_v27 = vld [vmem:[#allocation30_spill] sm:$0xff] }
 0x234   :  { %950 = vmatprep.subr.mxu0 %v2279_v28  ;;  %1021 = vmatprep.subr.mxu1 %v2281_v29  ;;  %v3412_v28 = vmov 0.0   ;;  %v3413_v29 = vld [vmem:[#allocation31_spill] sm:$0xff] }
 0x235   :  { %951 = vmatpush1.msra.mxu0 %v2287_v30  ;;  %1022 = vmatpush1.msra.mxu1 %v2289_v31 }
 0x236   :  { %952 = vmatprep.subr.mxu0 %v2298_v33  ;;  %1023 = vmatprep.subr.mxu1 %v2300_v34 }
 0x237   :  { %953 = vmatpush1.msra.mxu0 %v2304_v35  ;;  %1024 = vmatpush1.msra.mxu1 %v2306_v36 }
 0x238   :  { %954 = vmatprep.subr.mxu0 %v2310_v37  ;;  %1025 = vmatprep.subr.mxu1 %v2312_v38 }
 0x239   :  { %955 = vmatpush1.msra.mxu0 %v2318_v39  ;;  %1026 = vmatpush1.msra.mxu1 %v2320_v40 }
 0x23a   :  { %956 = vmatprep.subr.mxu0 %v2329_v42  ;;  %1027 = vmatprep.subr.mxu1 %v2331_v43 }
 0x23b   :  { %957 = vmatpush1.msra.mxu0 %v2335_v44  ;;  %1028 = vmatpush1.msra.mxu1 %v2337_v45 }
 0x23c   :  { %958 = vmatprep.subr.mxu0 %v2341_v46  ;;  %1029 = vmatprep.subr.mxu1 %v2343_v47 }
 0x23d   :  { %959 = vmatpush1.msra.mxu0 %v2349_v48  ;;  %1030 = vmatpush1.msra.mxu1 %v2351_v49 }
 0x23e   :  { %960 = vmatprep.subr.mxu0 %v2360_v51  ;;  %1031 = vmatprep.subr.mxu1 %v2362_v52 }
 0x23f   :  { %961 = vmatpush1.msra.mxu0 %v2366_v53  ;;  %1032 = vmatpush1.msra.mxu1 %v3366_v5 }
 0x240   :  { %962 = vmatprep.subr.mxu0 %v3367_v2  ;;  %1033 = vmatprep.subr.mxu1 %v3394_v8 }
 0x241   :  { %963 = vmatpush1.msra.mxu0 %v3395_v9  ;;  %1034 = vmatpush1.msra.mxu1 %v3396_v10 }
 0x242   :  { %964 = vmatprep.subr.mxu0 %v3397_v11  ;;  %1035 = vmatprep.subr.mxu1 %v3398_v12 }
 0x243   :  { %965 = vmatpush1.msra.mxu0 %v3399_v13  ;;  %1036 = vmatpush1.msra.mxu1 %v3400_v15 }
 0x244   :  { %966 = vmatprep.subr.mxu0 %v3401_v16  ;;  %1037 = vmatprep.subr.mxu1 %v3402_v17 }
 0x245   :  { %967 = vmatpush1.msra.mxu0 %v3403_v18  ;;  %1038 = vmatpush1.msra.mxu1 %v3404_v19 }
 0x246   :  { %968 = vmatprep.subr.mxu0 %v3405_v20  ;;  %1039 = vmatprep.subr.mxu1 %v3406_v21 }
 0x247   :  { %969 = vmatpush1.msra.mxu0 %v3407_v22  ;;  %1040 = vmatpush1.msra.mxu1 %v3408_v24 }
 0x248   :  { %970 = vmatprep.subr.mxu0 %v3409_v25  ;;  %1041 = vmatprep.subr.mxu1 %v3410_v26 }
 0x249   :  { %971 = vmatpush1.msra.mxu0 %v3411_v27  ;;  %1004 = vmatprep.mubr.f32.mxu0 %v3412_v28 }
 0x24a   :  { %1042 = vmatpush1.msra.mxu1 %v3413_v29  ;;  %1075 = vmatprep.mubr.f32.mxu1 %v3412_v28 }
 0x24b   :  { %1108 = vmatprep.subr.mxu0 %v3414_v4  ;;  %1179 = vmatprep.subr.mxu1 %v3415_v32 }
 0x2ea   :  { %v838_v50 = vpop.f32.mrf.mxu0  ;;  %v909_v0 = vpop.f32.mrf.mxu1 }
 0x2eb   :  { %v914_v56 = vadd.f32 %v838_v50, %v3416_v6  ;;  %v916_v14 = vadd.f32 %v909_v0, %v3419_v61  ;;  %v2773_v61 = vld [vmem:[#allocation3 + $0x1d8] sm:$0xff] }
 0x2ec   :  { %v840_v60 = vpop.f32.mrf.mxu0  ;;  %v911_v23 = vpop.f32.mrf.mxu1 }
 0x2ed   :  { %v918_v7 = vmul.f32 0.5, %v914_v56  ;;  %v915_v59 = vadd.f32 %v840_v60, %v3417_v41  ;;  %v917_v54 = vadd.f32 %v911_v23, %v3418_v58  ;;  %v920_v3 = vmul.f32 0.5, %v916_v14  ;;  %v2764_v58 = vld [vmem:[#allocation3 + $0x1e0] sm:$0xff] }
 0x2ee   :  { %v2776_v14 = vld [vmem:[#allocation3 + $0x1c0] sm:$0xff] }
 0x2ef   :  { %1973 = vtanh.f32 %v918_v7  ;;  %v919_v62 = vmul.f32 0.5, %v915_v59 }
 0x2f1   :  { %1975 = vtanh.f32 %v919_v62 }
 0x2f2   :  { %1977 = vtanh.f32 %v917_v54  ;;  %v2767_v54 = vld [vmem:[#allocation3 + $0x1f0] sm:$0xff] }
 0x2f3   :  { %1979 = vtanh.f32 %v920_v3  ;;  %v2779_v3 = vld [vmem:[#allocation3 + $0x1d0] sm:$0xff] }
 0x2fc   :  { %v1974_v55 = vpop.eup %1973 }
 0x2fd   :  { %v924_v57 = vadd.f32 1.0, %v1974_v55  ;;  %v2782_v55 = vld [vmem:[#allocation3 + $0x1a8] sm:$0xff] }
 0x2fe   :  { %v1976_v63 = vpop.eup %1975 }
 0x2ff   :  { %v927_v4 = vmul.f32 0.5, %v924_v57  ;;  %v925_v32 = vadd.f32 1.0, %v1976_v63  ;;  %v1978_v50 = vpop.eup %1977  ;;  %v2785_v57 = vld [vmem:[#allocation3 + $0x1b8] sm:$0xff]  ;;  %v2788_v63 = vld [vmem:[#allocation3 + $0x1a0] sm:$0xff] }
 0x300   :  { %v1980_v23 = vpop.eup %1979 }
 0x301   :  { %v928_v6 = vmul.f32 0.5, %v925_v32  ;;  %v932_v56 = vmul.f32 %v1978_v50, %v927_v4  ;;  %v926_v41 = vadd.f32 1.0, %v1980_v23  ;;  %v2791_v4 = vld [vmem:[#allocation3 + $0x1b0] sm:$0xff]  ;;  %v2794_v32 = vld [vmem:[#allocation3 + $0x188] sm:$0xff]  ;;  %v2797_v50 = vld [vmem:[#allocation3 + $0x198] sm:$0xff] }
 0x302   :  { %v2809_v23 = vld [vmem:[#allocation3 + $0x178] sm:$0xff] }
 0x303   :  { %v931_v60 = vmul.f32 %v928_v6, %v2687_v1  ;;  %v929_v59 = vmul.f32 0.5, %v926_v41  ;;  %v2770_v1 = vld [vmem:[#allocation3 + $0x1c8] sm:$0xff]  ;;  %v2800_v6 = vld [vmem:[#allocation3 + $0x180] sm:$0xff] }
 0x304   :  { %v2812_v41 = vld [vmem:[#allocation3 + $0x160] sm:$0xff] }
 0x305   :  { %v2761_v7 = vadd.f32 %v932_v56, %v931_v60  ;;  %v2803_v56 = vld [vmem:[#allocation3 + $0x190] sm:$0xff]  ;;  %v2806_v60 = vld [vmem:[#allocation3 + $0x168] sm:$0xff] }
 0x307   :  { %1981 = vtanh.f32 %v2761_v7 }
 0x314   :  { %v1982_v0 = vpop.eup %1981 }
 0x315   :  { %v935_v62 = vmul.f32 %v1982_v0, %v929_v59  ;;  %v2815_v59 = vld [vmem:[#allocation3 + $0x170] sm:$0xff]  ;;  %v2818_v0 = vld [vmem:[#allocation3 + $0x148] sm:$0xff] }
 0x317   :  { %1005 = vmatmul.mubr.f32.vlgmr.msra.gmra.mxu0 %v935_v62  ;;  %1076 = vmatmul.mubr.f32.vlgmr.msra.gmra.mxu1 %v935_v62  ;;  %v2821_v62 = vld [vmem:[#allocation3 + $0x158] sm:$0xff] }
 0x318   :  { %1109 = vmatpush1.msra.mxu0 %v2764_v58  ;;  %1180 = vmatpush1.msra.mxu1 %v2767_v54 }
 0x319   :  { %1110 = vmatprep.subr.mxu0 %v2770_v1  ;;  %1181 = vmatprep.subr.mxu1 %v2773_v61 }
 0x31a   :  { %1111 = vmatpush1.msra.mxu0 %v2776_v14  ;;  %1182 = vmatpush1.msra.mxu1 %v2779_v3 }
 0x31b   :  { %1112 = vmatprep.subr.mxu0 %v2782_v55  ;;  %1183 = vmatprep.subr.mxu1 %v2785_v57 }
 0x31c   :  { %1113 = vmatpush1.msra.mxu0 %v2788_v63  ;;  %1184 = vmatpush1.msra.mxu1 %v2791_v4 }
 0x31d   :  { %1114 = vmatprep.subr.mxu0 %v2794_v32  ;;  %1185 = vmatprep.subr.mxu1 %v2797_v50 }
 0x31e   :  { %1115 = vmatpush1.msra.mxu0 %v2800_v6  ;;  %1186 = vmatpush1.msra.mxu1 %v2803_v56 }
 0x31f   :  { %1116 = vmatprep.subr.mxu0 %v2806_v60  ;;  %1187 = vmatprep.subr.mxu1 %v2809_v23 }
 0x320   :  { %1117 = vmatpush1.msra.mxu0 %v2812_v41  ;;  %1188 = vmatpush1.msra.mxu1 %v2815_v59 }
 0x321   :  { %1118 = vmatprep.subr.mxu0 %v2818_v0  ;;  %1189 = vmatprep.subr.mxu1 %v2821_v62 }
 0x322   :  { %1119 = vmatpush1.msra.mxu0 %v2287_v30  ;;  %1190 = vmatpush1.msra.mxu1 %v2289_v31  ;;  %v2868_v30 = vld [vmem:[#allocation3 + $0x1e8] sm:$0xff]  ;;  %v2871_v31 = vld [vmem:[#allocation3 + $0x1f8] sm:$0xff] }
 0x323   :  { %1120 = vmatprep.subr.mxu0 %v2298_v33  ;;  %1191 = vmatprep.subr.mxu1 %v2300_v34  ;;  %3420 = vst [vmem:[#allocation11_spill] sm:$0xff] %v2868_v30  ;;  %3421 = vst [vmem:[#allocation12_spill] sm:$0xff] %v2871_v31 }
 0x324   :  { %1121 = vmatpush1.msra.mxu0 %v2304_v35  ;;  %1192 = vmatpush1.msra.mxu1 %v2306_v36  ;;  %v3422_v35 = vld [vmem:[#allocation40_spill] sm:$0xff] }
 0x325   :  { %1122 = vmatprep.subr.mxu0 %v2310_v37  ;;  %1193 = vmatprep.subr.mxu1 %v2312_v38 }
 0x326   :  { %1123 = vmatpush1.msra.mxu0 %v2318_v39  ;;  %1194 = vmatpush1.msra.mxu1 %v2320_v40  ;;  %v3423_v40 = vld [vmem:[#allocation42_spill] sm:$0xff] }
 0x327   :  { %1124 = vmatprep.subr.mxu0 %v2329_v42  ;;  %1195 = vmatprep.subr.mxu1 %v2331_v43 }
 0x328   :  { %1125 = vmatpush1.msra.mxu0 %v2335_v44  ;;  %1196 = vmatpush1.msra.mxu1 %v2337_v45  ;;  %v3424_v44 = vld [vmem:[#allocation43_spill] sm:$0xff] }
 0x329   :  { %1126 = vmatprep.subr.mxu0 %v2341_v46  ;;  %1197 = vmatprep.subr.mxu1 %v2343_v47  ;;  %v3425_v46 = vld [vmem:[#allocation41_spill] sm:$0xff] }
 0x32a   :  { %1127 = vmatpush1.msra.mxu0 %v2349_v48  ;;  %1198 = vmatpush1.msra.mxu1 %v2351_v49 }
 0x32b   :  { %1128 = vmatprep.subr.mxu0 %v2360_v51  ;;  %1199 = vmatprep.subr.mxu1 %v2362_v52 }
 0x32c   :  { %1129 = vmatpush1.msra.mxu0 %v2366_v53  ;;  %1200 = vmatpush1.msra.mxu1 %v3366_v5 }
 0x32d   :  { %1130 = vmatprep.subr.mxu0 %v3367_v2  ;;  %1201 = vmatprep.subr.mxu1 %v3394_v8 }
 0x32e   :  { %1131 = vmatpush1.msra.mxu0 %v3395_v9  ;;  %1202 = vmatpush1.msra.mxu1 %v3396_v10 }
 0x32f   :  { %1132 = vmatprep.subr.mxu0 %v3397_v11  ;;  %1203 = vmatprep.subr.mxu1 %v3398_v12 }
 0x330   :  { %1133 = vmatpush1.msra.mxu0 %v3399_v13  ;;  %1204 = vmatpush1.msra.mxu1 %v3400_v15 }
 0x331   :  { %1134 = vmatprep.subr.mxu0 %v3401_v16  ;;  %1205 = vmatprep.subr.mxu1 %v3402_v17 }
 0x332   :  { %1135 = vmatpush1.msra.mxu0 %v3403_v18  ;;  %1206 = vmatpush1.msra.mxu1 %v3404_v19  ;;  %v2902_v18 = vld [vmem:[#allocation3 + $0x140] sm:$0xff]  ;;  %v2905_v19 = vld [vmem:[#allocation3 + $0x150] sm:$0xff] }
 0x333   :  { %1136 = vmatprep.subr.mxu0 %v3405_v20  ;;  %1207 = vmatprep.subr.mxu1 %v3406_v21  ;;  %v2908_v20 = vld [vmem:[#allocation3 + $0x128] sm:$0xff]  ;;  %v2911_v21 = vld [vmem:[#allocation3 + $0x138] sm:$0xff] }
 0x334   :  { %1137 = vmatpush1.msra.mxu0 %v3407_v22  ;;  %1208 = vmatpush1.msra.mxu1 %v3408_v24  ;;  %v2914_v22 = vld [vmem:[#allocation3 + $0x120] sm:$0xff]  ;;  %v2917_v24 = vld [vmem:[#allocation3 + $0x130] sm:$0xff] }
 0x335   :  { %1138 = vmatprep.subr.mxu0 %v3409_v25  ;;  %1209 = vmatprep.subr.mxu1 %v3410_v26  ;;  %v2920_v25 = vld [vmem:[#allocation3 + $0x108] sm:$0xff]  ;;  %v2923_v26 = vld [vmem:[#allocation3 + $0x118] sm:$0xff] }
 0x336   :  { %1139 = vmatpush1.msra.mxu0 %v3411_v27  ;;  %1172 = vmatprep.mubr.f32.mxu0 %v3412_v28  ;;  %v2926_v27 = vld [vmem:[#allocation3 + $0x100] sm:$0xff] }
 0x337   :  { %1210 = vmatpush1.msra.mxu1 %v3413_v29  ;;  %1243 = vmatprep.mubr.f32.mxu1 %v3412_v28  ;;  %v2929_v29 = vld [vmem:[#allocation3 + $0x110] sm:$0xff] }
 0x338   :  { %1276 = vmatprep.subr.mxu0 %v2868_v30  ;;  %1347 = vmatprep.subr.mxu1 %v2871_v31 }
 0x3d7   :  { %v1006_v33 = vpop.f32.mrf.mxu0  ;;  %v1077_v34 = vpop.f32.mrf.mxu1 }
 0x3d8   :  { %v1082_v36 = vadd.f32 %v1006_v33, %v3422_v35  ;;  %v1084_v47 = vadd.f32 %v1077_v34, %v3425_v46  ;;  %v2935_v33 = vld [vmem:[#allocation3 + $0xf8] sm:$0xff]  ;;  %v2938_v34 = vld [vmem:[#allocation3 + $0xe0] sm:$0xff]  ;;  %v2941_v35 = vld [vmem:[#allocation3 + $0xf0] sm:$0xff] }
 0x3d9   :  { %v1008_v37 = vpop.f32.mrf.mxu0  ;;  %v1079_v38 = vpop.f32.mrf.mxu1  ;;  %v2971_v46 = vld [vmem:[#allocation3 + $0x98] sm:$0xff] }
 0x3da   :  { %v1086_v39 = vmul.f32 0.5, %v1082_v36  ;;  %v1083_v42 = vadd.f32 %v1008_v37, %v3423_v40  ;;  %v1085_v45 = vadd.f32 %v1079_v38, %v3424_v44  ;;  %v1088_v48 = vmul.f32 0.5, %v1084_v47  ;;  %v2944_v36 = vld [vmem:[#allocation3 + $0xc8] sm:$0xff]  ;;  %v2947_v37 = vld [vmem:[#allocation3 + $0xd8] sm:$0xff]  ;;  %v2950_v38 = vld [vmem:[#allocation3 + $0xc0] sm:$0xff]  ;;  %3426 = vst [vmem:[#allocation32_spill] sm:$0xff] %v2971_v46 }
 0x3db   :  { %v2956_v40 = vld [vmem:[#allocation3 + $0xa8] sm:$0xff]  ;;  %v2965_v44 = vld [vmem:[#allocation3 + $0xb0] sm:$0xff]  ;;  %v2974_v47 = vld [vmem:[#allocation3 + $0x80] sm:$0xff] }
 0x3dc   :  { %1983 = vtanh.f32 %v1086_v39  ;;  %v1087_v43 = vmul.f32 0.5, %v1083_v42  ;;  %v2953_v39 = vld [vmem:[#allocation3 + $0xd0] sm:$0xff]  ;;  %v2959_v42 = vld [vmem:[#allocation3 + $0xb8] sm:$0xff]  ;;  %3427 = vst [vmem:[#allocation34_spill] sm:$0xff] %v2974_v47 }
 0x3de   :  { %1985 = vtanh.f32 %v1087_v43  ;;  %v2962_v43 = vld [vmem:[#allocation3 + $0xa0] sm:$0xff] }
 0x3df   :  { %1987 = vtanh.f32 %v1085_v45  ;;  %v2968_v45 = vld [vmem:[#allocation3 + $0x88] sm:$0xff] }
 0x3e0   :  { %1989 = vtanh.f32 %v1088_v48  ;;  %v2977_v48 = vld [vmem:[#allocation3 + $0x90] sm:$0xff] }
 0x3e1   :  { %3428 = vst [vmem:[#allocation35_spill] sm:$0xff] %v2977_v48 }
 0x3e9   :  { %v1984_v49 = vpop.eup %1983 }
 0x3ea   :  { %v1092_v51 = vadd.f32 1.0, %v1984_v49  ;;  %v2980_v49 = vld [vmem:[#allocation3 + $0x68] sm:$0xff] }
 0x3eb   :  { %v1986_v52 = vpop.eup %1985  ;;  %3429 = vst [vmem:[#allocation33_spill] sm:$0xff] %v2980_v49 }
 0x3ec   :  { %v1095_v53 = vmul.f32 0.5, %v1092_v51  ;;  %v1093_v5 = vadd.f32 1.0, %v1986_v52  ;;  %v1988_v2 = vpop.eup %1987  ;;  %v2983_v51 = vld [vmem:[#allocation3 + $0x78] sm:$0xff]  ;;  %v2986_v52 = vld [vmem:[#allocation3 + $0x60] sm:$0xff] }
 0x3ed   :  { %v1990_v12 = vpop.eup %1989  ;;  %3430 = vst [vmem:[#allocation13_spill] sm:$0xff] %v2983_v51  ;;  %3431 = vst [vmem:[#allocation14_spill] sm:$0xff] %v2986_v52 }
 0x3ee   :  { %v1096_v8 = vmul.f32 0.5, %v1093_v5  ;;  %v1100_v9 = vmul.f32 %v1988_v2, %v1095_v53  ;;  %v1094_v13 = vadd.f32 1.0, %v1990_v12  ;;  %v2989_v53 = vld [vmem:[#allocation3 + $0x70] sm:$0xff]  ;;  %v2992_v5 = vld [vmem:[#allocation3 + $0x48] sm:$0xff]  ;;  %v2995_v2 = vld [vmem:[#allocation3 + $0x58] sm:$0xff] }
 0x3ef   :  { %3432 = vst [vmem:[#allocation15_spill] sm:$0xff] %v2989_v53  ;;  %3433 = vst [vmem:[#allocation16_spill] sm:$0xff] %v2992_v5  ;;  %v3007_v12 = vld [vmem:[#allocation3 + $0x38] sm:$0xff] }
 0x3f0   :  { %v1099_v10 = vmul.f32 %v1096_v8, %v2761_v7  ;;  %v1097_v15 = vmul.f32 0.5, %v1094_v13  ;;  %v2932_v7 = vld [vmem:[#allocation3 + $0xe8] sm:$0xff]  ;;  %3434 = vst [vmem:[#allocation17_spill] sm:$0xff] %v2995_v2  ;;  %v2998_v8 = vld [vmem:[#allocation3 + $0x40] sm:$0xff]  ;;  %3438 = vst [vmem:[#allocation21_spill] sm:$0xff] %v3007_v12 }
 0x3f1   :  { %3435 = vst [vmem:[#allocation18_spill] sm:$0xff] %v2998_v8  ;;  %v3010_v13 = vld [vmem:[#allocation3 + $0x20] sm:$0xff] }
 0x3f2   :  { %v2879_v11 = vadd.f32 %v1100_v9, %v1099_v10  ;;  %v3001_v9 = vld [vmem:[#allocation3 + $0x50] sm:$0xff]  ;;  %v3004_v10 = vld [vmem:[#allocation3 + $0x28] sm:$0xff]  ;;  %3439 = vst [vmem:[#allocation22_spill] sm:$0xff] %v3010_v13 }
 0x3f3   :  { %3436 = vst [vmem:[#allocation19_spill] sm:$0xff] %v3001_v9  ;;  %3437 = vst [vmem:[#allocation20_spill] sm:$0xff] %v3004_v10 }
 0x3f4   :  { %1991 = vtanh.f32 %v2879_v11 }
 0x401   :  { %v1992_v16 = vpop.eup %1991 }
 0x402   :  { %v1103_v17 = vmul.f32 %v1992_v16, %v1097_v15  ;;  %v3013_v15 = vld [vmem:[#allocation3 + $0x30] sm:$0xff]  ;;  %v3016_v16 = vld [vmem:[#allocation3 + $0x8] sm:$0xff] }
 0x403   :  { %3440 = vst [vmem:[#allocation23_spill] sm:$0xff] %v3013_v15  ;;  %3441 = vst [vmem:[#allocation24_spill] sm:$0xff] %v3016_v16 }
 0x404   :  { %1173 = vmatmul.mubr.f32.vlgmr.msra.gmra.mxu0 %v1103_v17  ;;  %1244 = vmatmul.mubr.f32.vlgmr.msra.gmra.mxu1 %v1103_v17  ;;  %v3019_v17 = vld [vmem:[#allocation3 + $0x18] sm:$0xff] }
 0x405   :  { %1277 = vmatpush1.msra.mxu0 %v2764_v58  ;;  %1348 = vmatpush1.msra.mxu1 %v2767_v54  ;;  %3442 = vst [vmem:[#allocation25_spill] sm:$0xff] %v3019_v17 }
 0x406   :  { %1278 = vmatprep.subr.mxu0 %v2770_v1  ;;  %1349 = vmatprep.subr.mxu1 %v2773_v61 }
 0x407   :  { %1279 = vmatpush1.msra.mxu0 %v2776_v14  ;;  %1350 = vmatpush1.msra.mxu1 %v2779_v3 }
 0x408   :  { %1280 = vmatprep.subr.mxu0 %v2782_v55  ;;  %1351 = vmatprep.subr.mxu1 %v2785_v57 }
 0x409   :  { %1281 = vmatpush1.msra.mxu0 %v2788_v63  ;;  %1352 = vmatpush1.msra.mxu1 %v2791_v4 }
 0x40a   :  { %1282 = vmatprep.subr.mxu0 %v2794_v32  ;;  %1353 = vmatprep.subr.mxu1 %v2797_v50 }
 0x40b   :  { %1283 = vmatpush1.msra.mxu0 %v2800_v6  ;;  %1354 = vmatpush1.msra.mxu1 %v2803_v56 }
 0x40c   :  { %1284 = vmatprep.subr.mxu0 %v2806_v60  ;;  %1355 = vmatprep.subr.mxu1 %v2809_v23 }
 0x40d   :  { %1285 = vmatpush1.msra.mxu0 %v2812_v41  ;;  %1356 = vmatpush1.msra.mxu1 %v2815_v59 }
 0x40e   :  { %1286 = vmatprep.subr.mxu0 %v2818_v0  ;;  %1357 = vmatprep.subr.mxu1 %v2821_v62 }
 0x40f   :  { %1287 = vmatpush1.msra.mxu0 %v2902_v18  ;;  %1358 = vmatpush1.msra.mxu1 %v2905_v19 }
 0x410   :  { %1288 = vmatprep.subr.mxu0 %v2908_v20  ;;  %1359 = vmatprep.subr.mxu1 %v2911_v21 }
 0x411   :  { %1289 = vmatpush1.msra.mxu0 %v2914_v22  ;;  %1360 = vmatpush1.msra.mxu1 %v2917_v24 }
 0x412   :  { %1290 = vmatprep.subr.mxu0 %v2920_v25  ;;  %1361 = vmatprep.subr.mxu1 %v2923_v26 }
 0x413   :  { %1291 = vmatpush1.msra.mxu0 %v2926_v27  ;;  %1362 = vmatpush1.msra.mxu1 %v2929_v29 }
 0x414   :  { %1292 = vmatprep.subr.mxu0 %v2932_v7  ;;  %1363 = vmatprep.subr.mxu1 %v2935_v33 }
 0x415   :  { %1293 = vmatpush1.msra.mxu0 %v2938_v34  ;;  %1364 = vmatpush1.msra.mxu1 %v2941_v35 }
 0x416   :  { %1294 = vmatprep.subr.mxu0 %v2944_v36  ;;  %1365 = vmatprep.subr.mxu1 %v2947_v37 }
 0x417   :  { %1295 = vmatpush1.msra.mxu0 %v2950_v38  ;;  %1366 = vmatpush1.msra.mxu1 %v2953_v39 }
 0x418   :  { %1296 = vmatprep.subr.mxu0 %v2956_v40  ;;  %1367 = vmatprep.subr.mxu1 %v2959_v42 }
 0x419   :  { %1297 = vmatpush1.msra.mxu0 %v2962_v43  ;;  %1368 = vmatpush1.msra.mxu1 %v2965_v44 }
 0x41a   :  { %1298 = vmatprep.subr.mxu0 %v2968_v45  ;;  %1369 = vmatprep.subr.mxu1 %v2971_v46 }
 0x41b   :  { %1299 = vmatpush1.msra.mxu0 %v2974_v47  ;;  %1370 = vmatpush1.msra.mxu1 %v2977_v48 }
 0x41c   :  { %1300 = vmatprep.subr.mxu0 %v2980_v49  ;;  %1371 = vmatprep.subr.mxu1 %v2983_v51 }
 0x41d   :  { %1301 = vmatpush1.msra.mxu0 %v2986_v52  ;;  %1372 = vmatpush1.msra.mxu1 %v2989_v53  ;;  %v3447_v52 = vld [vmem:[#allocation47_spill] sm:$0xff] }
 0x41e   :  { %1302 = vmatprep.subr.mxu0 %v2992_v5  ;;  %1373 = vmatprep.subr.mxu1 %v2995_v2 }
 0x41f   :  { %1303 = vmatpush1.msra.mxu0 %v2998_v8  ;;  %1374 = vmatpush1.msra.mxu1 %v3001_v9 }
 0x420   :  { %1304 = vmatprep.subr.mxu0 %v3004_v10  ;;  %1375 = vmatprep.subr.mxu1 %v3007_v12  ;;  %v3022_v10 = vld [vmem:[#allocation3] sm:$0xff]  ;;  %v3026_v12 = vld [vmem:[#allocation3 + $0x10] sm:$0xff] }
 0x421   :  { %1305 = vmatpush1.msra.mxu0 %v3010_v13  ;;  %1376 = vmatpush1.msra.mxu1 %v3013_v15  ;;  %3443 = vst [vmem:[#allocation26_spill] sm:$0xff] %v3022_v10  ;;  %3444 = vst [vmem:[#allocation27_spill] sm:$0xff] %v3026_v12  ;;  %v3445_v13 = vld [vmem:[#allocation44_spill] sm:$0xff] }
 0x422   :  { %1306 = vmatprep.subr.mxu0 %v3016_v16  ;;  %1377 = vmatprep.subr.mxu1 %v3019_v17 }
 0x423   :  { %1307 = vmatpush1.msra.mxu0 %v3022_v10  ;;  %1340 = vmatprep.mubr.f32.mxu0 %v3412_v28  ;;  %v3446_v10 = vld [vmem:[#allocation46_spill] sm:$0xff] }
 0x424   :  { %1378 = vmatpush1.msra.mxu1 %v3026_v12  ;;  %1411 = vmatprep.mubr.f32.mxu1 %v3412_v28  ;;  %v3448_v12 = vld [vmem:[#allocation45_spill] sm:$0xff] }
 0x425   :  { %1444 = vmatprep.subr.mxu0 %v2868_v30  ;;  %1515 = vmatprep.subr.mxu1 %v2871_v31 }
 0x4c4   :  { %v1174_v16 = vpop.f32.mrf.mxu0  ;;  %v1245_v15 = vpop.f32.mrf.mxu1 }
 0x4c5   :  { %v1250_v17 = vadd.f32 %v1174_v16, %v3445_v13  ;;  %v1252_v28 = vadd.f32 %v1245_v15, %v3448_v12  ;;  %v3458_v12 = vld [vmem:[#allocation18_spill] sm:$0xff]  ;;  %v3459_v15 = vld [vmem:[#allocation19_spill] sm:$0xff] }
 0x4c6   :  { %v1176_v9 = vpop.f32.mrf.mxu0  ;;  %v1247_v8 = vpop.f32.mrf.mxu1 }
 0x4c7   :  { %v1254_v2 = vmul.f32 0.5, %v1250_v17  ;;  %v1251_v5 = vadd.f32 %v1176_v9, %v3446_v10  ;;  %v1253_v51 = vadd.f32 %v1247_v8, %v3447_v52  ;;  %v1256_v30 = vmul.f32 0.5, %v1252_v28  ;;  %v3456_v8 = vld [vmem:[#allocation16_spill] sm:$0xff]  ;;  %v3457_v10 = vld [vmem:[#allocation17_spill] sm:$0xff] }
 0x4c9   :  { %1993 = vtanh.f32 %v1254_v2  ;;  %v1255_v53 = vmul.f32 0.5, %v1251_v5 }
 0x4cb   :  { %1995 = vtanh.f32 %v1255_v53 }
 0x4cc   :  { %1997 = vtanh.f32 %v1253_v51 }
 0x4cd   :  { %1999 = vtanh.f32 %v1256_v30  ;;  %v3449_v30 = vld [vmem:[#allocation32_spill] sm:$0xff] }
 0x4d6   :  { %v1994_v49 = vpop.eup %1993 }
 0x4d7   :  { %v1260_v31 = vadd.f32 1.0, %v1994_v49  ;;  %v3455_v49 = vld [vmem:[#allocation15_spill] sm:$0xff] }
 0x4d8   :  { %v1996_v48 = vpop.eup %1995 }
 0x4d9   :  { %v1263_v47 = vmul.f32 0.5, %v1260_v31  ;;  %v1261_v13 = vadd.f32 1.0, %v1996_v48  ;;  %v1998_v16 = vpop.eup %1997  ;;  %v3450_v31 = vld [vmem:[#allocation34_spill] sm:$0xff] }
 0x4da   :  { %v2000_v52 = vpop.eup %1999  ;;  %v3454_v48 = vld [vmem:[#allocation14_spill] sm:$0xff] }
 0x4db   :  { %v1264_v46 = vmul.f32 0.5, %v1261_v13  ;;  %v1268_v17 = vmul.f32 %v1998_v16, %v1263_v47  ;;  %v1262_v51 = vadd.f32 1.0, %v2000_v52  ;;  %v3453_v47 = vld [vmem:[#allocation13_spill] sm:$0xff]  ;;  %v3460_v13 = vld [vmem:[#allocation20_spill] sm:$0xff] }
 0x4dc   :  { %v3461_v16 = vld [vmem:[#allocation21_spill] sm:$0xff]  ;;  %v3464_v52 = vld [vmem:[#allocation24_spill] sm:$0xff] }
 0x4dd   :  { %v1267_v9 = vmul.f32 %v1264_v46, %v2879_v11  ;;  %v1265_v53 = vmul.f32 0.5, %v1262_v51  ;;  %v3451_v11 = vld [vmem:[#allocation35_spill] sm:$0xff]  ;;  %v3452_v46 = vld [vmem:[#allocation33_spill] sm:$0xff] }
 0x4de   :  { %v3465_v51 = vld [vmem:[#allocation25_spill] sm:$0xff] }
 0x4df   :  { %v3037_v2 = vadd.f32 %v1268_v17, %v1267_v9  ;;  %v3462_v17 = vld [vmem:[#allocation22_spill] sm:$0xff]  ;;  %v3463_v9 = vld [vmem:[#allocation23_spill] sm:$0xff] }
 0x4e1   :  { %2001 = vtanh.f32 %v3037_v2 }
 0x4ee   :  { %v2002_v5 = vpop.eup %2001 }
 0x4ef   :  { %v1271_v28 = vmul.f32 %v2002_v5, %v1265_v53  ;;  %v3466_v53 = vld [vmem:[#allocation26_spill] sm:$0xff]  ;;  %v3467_v5 = vmov 0.0  }
 0x4f1   :  { %1341 = vmatmul.mubr.f32.vlgmr.msra.gmra.mxu0 %v1271_v28  ;;  %1412 = vmatmul.mubr.f32.vlgmr.msra.gmra.mxu1 %v1271_v28  ;;  %v3468_v28 = vld [vmem:[#allocation27_spill] sm:$0xff] }
 0x4f2   :  { %1445 = vmatpush1.msra.mxu0 %v2764_v58  ;;  %1516 = vmatpush1.msra.mxu1 %v2767_v54 }
 0x4f3   :  { %1446 = vmatprep.subr.mxu0 %v2770_v1  ;;  %1517 = vmatprep.subr.mxu1 %v2773_v61 }
 0x4f4   :  { %1447 = vmatpush1.msra.mxu0 %v2776_v14  ;;  %1518 = vmatpush1.msra.mxu1 %v2779_v3 }
 0x4f5   :  { %1448 = vmatprep.subr.mxu0 %v2782_v55  ;;  %1519 = vmatprep.subr.mxu1 %v2785_v57 }
 0x4f6   :  { %1449 = vmatpush1.msra.mxu0 %v2788_v63  ;;  %1520 = vmatpush1.msra.mxu1 %v2791_v4 }
 0x4f7   :  { %1450 = vmatprep.subr.mxu0 %v2794_v32  ;;  %1521 = vmatprep.subr.mxu1 %v2797_v50 }
 0x4f8   :  { %1451 = vmatpush1.msra.mxu0 %v2800_v6  ;;  %1522 = vmatpush1.msra.mxu1 %v2803_v56 }
 0x4f9   :  { %1452 = vmatprep.subr.mxu0 %v2806_v60  ;;  %1523 = vmatprep.subr.mxu1 %v2809_v23 }
 0x4fa   :  { %1453 = vmatpush1.msra.mxu0 %v2812_v41  ;;  %1524 = vmatpush1.msra.mxu1 %v2815_v59 }
 0x4fb   :  { %1454 = vmatprep.subr.mxu0 %v2818_v0  ;;  %1525 = vmatprep.subr.mxu1 %v2821_v62 }
 0x4fc   :  { %1455 = vmatpush1.msra.mxu0 %v2902_v18  ;;  %1526 = vmatpush1.msra.mxu1 %v2905_v19 }
 0x4fd   :  { %1456 = vmatprep.subr.mxu0 %v2908_v20  ;;  %1527 = vmatprep.subr.mxu1 %v2911_v21 }
 0x4fe   :  { %1457 = vmatpush1.msra.mxu0 %v2914_v22  ;;  %1528 = vmatpush1.msra.mxu1 %v2917_v24 }
 0x4ff   :  { %1458 = vmatprep.subr.mxu0 %v2920_v25  ;;  %1529 = vmatprep.subr.mxu1 %v2923_v26 }
 0x500   :  { %1459 = vmatpush1.msra.mxu0 %v2926_v27  ;;  %1530 = vmatpush1.msra.mxu1 %v2929_v29 }
 0x501   :  { %1460 = vmatprep.subr.mxu0 %v2932_v7  ;;  %1531 = vmatprep.subr.mxu1 %v2935_v33 }
 0x502   :  { %1461 = vmatpush1.msra.mxu0 %v2938_v34  ;;  %1532 = vmatpush1.msra.mxu1 %v2941_v35 }
 0x503   :  { %1462 = vmatprep.subr.mxu0 %v2944_v36  ;;  %1533 = vmatprep.subr.mxu1 %v2947_v37 }
 0x504   :  { %1463 = vmatpush1.msra.mxu0 %v2950_v38  ;;  %1534 = vmatpush1.msra.mxu1 %v2953_v39 }
 0x505   :  { %1464 = vmatprep.subr.mxu0 %v2956_v40  ;;  %1535 = vmatprep.subr.mxu1 %v2959_v42 }
 0x506   :  { %1465 = vmatpush1.msra.mxu0 %v2962_v43  ;;  %1536 = vmatpush1.msra.mxu1 %v2965_v44 }
 0x507   :  { %1466 = vmatprep.subr.mxu0 %v2968_v45  ;;  %1537 = vmatprep.subr.mxu1 %v3449_v30 }
 0x508   :  { %1467 = vmatpush1.msra.mxu0 %v3450_v31  ;;  %1538 = vmatpush1.msra.mxu1 %v3451_v11 }
 0x509   :  { %1468 = vmatprep.subr.mxu0 %v3452_v46  ;;  %1539 = vmatprep.subr.mxu1 %v3453_v47 }
 0x50a   :  { %1469 = vmatpush1.msra.mxu0 %v3454_v48  ;;  %1540 = vmatpush1.msra.mxu1 %v3455_v49  ;;  %v3473_v48 = vld [vmem:[#allocation51_spill] sm:$0xff] }
 0x50b   :  { %1470 = vmatprep.subr.mxu0 %v3456_v8  ;;  %1541 = vmatprep.subr.mxu1 %v3457_v10 }
 0x50c   :  { %1471 = vmatpush1.msra.mxu0 %v3458_v12  ;;  %1542 = vmatpush1.msra.mxu1 %v3459_v15  ;;  %v3469_v15 = vld [vmem:[#allocation11_spill] sm:$0xff]  ;;  %v3471_v12 = vld [vmem:[#allocation48_spill] sm:$0xff] }
 0x50d   :  { %1472 = vmatprep.subr.mxu0 %v3460_v13  ;;  %1543 = vmatprep.subr.mxu1 %v3461_v16  ;;  %v3470_v13 = vld [vmem:[#allocation12_spill] sm:$0xff] }
 0x50e   :  { %1473 = vmatpush1.msra.mxu0 %v3462_v17  ;;  %1544 = vmatpush1.msra.mxu1 %v3463_v9 }
 0x50f   :  { %1474 = vmatprep.subr.mxu0 %v3464_v52  ;;  %1545 = vmatprep.subr.mxu1 %v3465_v51  ;;  %v3472_v51 = vld [vmem:[#allocation50_spill] sm:$0xff] }
 0x510   :  { %1475 = vmatpush1.msra.mxu0 %v3466_v53  ;;  %1508 = vmatprep.mubr.f32.mxu0 %v3467_v5 }
 0x511   :  { %1546 = vmatpush1.msra.mxu1 %v3468_v28  ;;  %1579 = vmatprep.mubr.f32.mxu1 %v3467_v5  ;;  %v3474_v28 = vld [vmem:[#allocation49_spill] sm:$0xff] }
 0x512   :  { %1612 = vmatprep.subr.mxu0 %v3469_v15  ;;  %1683 = vmatprep.subr.mxu1 %v3470_v13 }
 0x5b1   :  { %v1342_v16 = vpop.f32.mrf.mxu0  ;;  %v1413_v17 = vpop.f32.mrf.mxu1 }
 0x5b2   :  { %v1418_v9 = vadd.f32 %v1342_v16, %v3471_v12  ;;  %v1420_v5 = vadd.f32 %v1413_v17, %v3474_v28  ;;  %v1790_v28 = vld [vmem:[#allocation5 + $0x70] sm:$0xff] }
 0x5b3   :  { %v1344_v10 = vpop.f32.mrf.mxu0  ;;  %v1415_v52 = vpop.f32.mrf.mxu1 }
 0x5b4   :  { %v1422_v8 = vmul.f32 0.5, %v1418_v9  ;;  %v1419_v49 = vadd.f32 %v1344_v10, %v3472_v51  ;;  %v1421_v47 = vadd.f32 %v1415_v52, %v3473_v48  ;;  %v1424_v15 = vmul.f32 0.5, %v1420_v5  ;;  %v1791_v5 = vld [vmem:[#allocation5 + $0x78] sm:$0xff] }
 0x5b6   :  { %2003 = vtanh.f32 %v1422_v8  ;;  %v1423_v53 = vmul.f32 0.5, %v1419_v49 }
 0x5b8   :  { %2005 = vtanh.f32 %v1423_v53 }
 0x5b9   :  { %2007 = vtanh.f32 %v1421_v47 }
 0x5ba   :  { %2009 = vtanh.f32 %v1424_v15  ;;  %v1789_v15 = vld [vmem:[#allocation5 + $0x68] sm:$0xff] }
 0x5c3   :  { %v2004_v46 = vpop.eup %2003 }
 0x5c4   :  { %v1428_v13 = vadd.f32 1.0, %v2004_v46 }
 0x5c5   :  { %v2006_v11 = vpop.eup %2005 }
 0x5c6   :  { %v1431_v31 = vmul.f32 0.5, %v1428_v13  ;;  %v1429_v12 = vadd.f32 1.0, %v2006_v11  ;;  %v2008_v16 = vpop.eup %2007  ;;  %v1788_v13 = vld [vmem:[#allocation5 + $0x60] sm:$0xff] }
 0x5c7   :  { %v2010_v48 = vpop.eup %2009 }
 0x5c8   :  { %v1432_v30 = vmul.f32 0.5, %v1429_v12  ;;  %v1436_v9 = vmul.f32 %v2008_v16, %v1431_v31  ;;  %v1430_v47 = vadd.f32 1.0, %v2010_v48  ;;  %v1787_v12 = vld [vmem:[#allocation5 + $0x58] sm:$0xff]  ;;  %v1786_v16 = vld [vmem:[#allocation5 + $0x50] sm:$0xff] }
 0x5c9   :  { %v1782_v48 = vld [vmem:[#allocation5 + $0x30] sm:$0xff] }
 0x5ca   :  { %v1435_v10 = vmul.f32 %v1432_v30, %v3037_v2  ;;  %v1433_v49 = vmul.f32 0.5, %v1430_v47  ;;  %v1781_v47 = vld [vmem:[#allocation5 + $0x28] sm:$0xff] }
 0x5cc   :  { %v3111_v8 = vadd.f32 %v1436_v9, %v1435_v10  ;;  %v1785_v9 = vld [vmem:[#allocation5 + $0x48] sm:$0xff]  ;;  %v1784_v10 = vld [vmem:[#allocation5 + $0x40] sm:$0xff] }
 0x5ce   :  { %2011 = vtanh.f32 %v3111_v8 }
 0x5db   :  { %v2012_v17 = vpop.eup %2011 }
 0x5dc   :  { %v1439_v52 = vmul.f32 %v2012_v17, %v1433_v49  ;;  %v1780_v49 = vld [vmem:[#allocation5 + $0x20] sm:$0xff]  ;;  %v1779_v17 = vld [vmem:[#allocation5 + $0x18] sm:$0xff] }
 0x5de   :  { %1509 = vmatmul.mubr.f32.vlgmr.msra.gmra.mxu0 %v1439_v52  ;;  %1580 = vmatmul.mubr.f32.vlgmr.msra.gmra.mxu1 %v1439_v52  ;;  %v1778_v52 = vld [vmem:[#allocation5 + $0x10] sm:$0xff] }
 0x5df   :  { %1613 = vmatpush1.msra.mxu0 %v2764_v58  ;;  %1684 = vmatpush1.msra.mxu1 %v2767_v54  ;;  %v3475_v58 = vld [vmem:[#allocation32_spill] sm:$0xff]  ;;  %v3476_v54 = vld [vmem:[#allocation34_spill] sm:$0xff] }
 0x5e0   :  { %1614 = vmatprep.subr.mxu0 %v2770_v1  ;;  %1685 = vmatprep.subr.mxu1 %v2773_v61  ;;  %v3477_v1 = vld [vmem:[#allocation35_spill] sm:$0xff]  ;;  %v3478_v61 = vld [vmem:[#allocation33_spill] sm:$0xff] }
 0x5e1   :  { %1615 = vmatpush1.msra.mxu0 %v2776_v14  ;;  %1686 = vmatpush1.msra.mxu1 %v2779_v3  ;;  %v3479_v14 = vld [vmem:[#allocation13_spill] sm:$0xff]  ;;  %v3480_v3 = vld [vmem:[#allocation14_spill] sm:$0xff] }
 0x5e2   :  { %1616 = vmatprep.subr.mxu0 %v2782_v55  ;;  %1687 = vmatprep.subr.mxu1 %v2785_v57  ;;  %v3481_v55 = vld [vmem:[#allocation15_spill] sm:$0xff]  ;;  %v3482_v57 = vld [vmem:[#allocation16_spill] sm:$0xff] }
 0x5e3   :  { %1617 = vmatpush1.msra.mxu0 %v2788_v63  ;;  %1688 = vmatpush1.msra.mxu1 %v2791_v4  ;;  %v3483_v63 = vld [vmem:[#allocation17_spill] sm:$0xff]  ;;  %v3484_v4 = vld [vmem:[#allocation18_spill] sm:$0xff] }
 0x5e4   :  { %1618 = vmatprep.subr.mxu0 %v2794_v32  ;;  %1689 = vmatprep.subr.mxu1 %v2797_v50  ;;  %v3485_v32 = vld [vmem:[#allocation19_spill] sm:$0xff]  ;;  %v3486_v50 = vld [vmem:[#allocation20_spill] sm:$0xff] }
 0x5e5   :  { %1619 = vmatpush1.msra.mxu0 %v2800_v6  ;;  %1690 = vmatpush1.msra.mxu1 %v2803_v56  ;;  %v3487_v6 = vld [vmem:[#allocation21_spill] sm:$0xff]  ;;  %v3488_v56 = vld [vmem:[#allocation22_spill] sm:$0xff] }
 0x5e6   :  { %1620 = vmatprep.subr.mxu0 %v2806_v60  ;;  %1691 = vmatprep.subr.mxu1 %v2809_v23  ;;  %v3489_v60 = vld [vmem:[#allocation23_spill] sm:$0xff]  ;;  %v3490_v23 = vld [vmem:[#allocation24_spill] sm:$0xff] }
 0x5e7   :  { %1621 = vmatpush1.msra.mxu0 %v2812_v41  ;;  %1692 = vmatpush1.msra.mxu1 %v2815_v59  ;;  %v3491_v41 = vld [vmem:[#allocation25_spill] sm:$0xff]  ;;  %v3492_v59 = vld [vmem:[#allocation26_spill] sm:$0xff] }
 0x5e8   :  { %1622 = vmatprep.subr.mxu0 %v2818_v0  ;;  %1693 = vmatprep.subr.mxu1 %v2821_v62  ;;  %v3493_v0 = vmov 0.0   ;;  %v3494_v62 = vld [vmem:[#allocation27_spill] sm:$0xff] }
 0x5e9   :  { %1623 = vmatpush1.msra.mxu0 %v2902_v18  ;;  %1694 = vmatpush1.msra.mxu1 %v2905_v19 }
 0x5ea   :  { %1624 = vmatprep.subr.mxu0 %v2908_v20  ;;  %1695 = vmatprep.subr.mxu1 %v2911_v21  ;;  %v3495_v20 = vld [vmem:[#allocation52_spill] sm:$0xff] }
 0x5eb   :  { %1625 = vmatpush1.msra.mxu0 %v2914_v22  ;;  %1696 = vmatpush1.msra.mxu1 %v2917_v24 }
 0x5ec   :  { %1626 = vmatprep.subr.mxu0 %v2920_v25  ;;  %1697 = vmatprep.subr.mxu1 %v2923_v26  ;;  %v3496_v26 = vld [vmem:[#allocation54_spill] sm:$0xff] }
 0x5ed   :  { %1627 = vmatpush1.msra.mxu0 %v2926_v27  ;;  %1698 = vmatpush1.msra.mxu1 %v2929_v29 }
 0x5ee   :  { %1628 = vmatprep.subr.mxu0 %v2932_v7  ;;  %1699 = vmatprep.subr.mxu1 %v2935_v33  ;;  %v3497_v7 = vld [vmem:[#allocation55_spill] sm:$0xff] }
 0x5ef   :  { %1629 = vmatpush1.msra.mxu0 %v2938_v34  ;;  %1700 = vmatpush1.msra.mxu1 %v2941_v35  ;;  %v3498_v34 = vld [vmem:[#allocation53_spill] sm:$0xff] }
 0x5f0   :  { %1630 = vmatprep.subr.mxu0 %v2944_v36  ;;  %1701 = vmatprep.subr.mxu1 %v2947_v37 }
 0x5f1   :  { %1631 = vmatpush1.msra.mxu0 %v2950_v38  ;;  %1702 = vmatpush1.msra.mxu1 %v2953_v39 }
 0x5f2   :  { %1632 = vmatprep.subr.mxu0 %v2956_v40  ;;  %1703 = vmatprep.subr.mxu1 %v2959_v42 }
 0x5f3   :  { %1633 = vmatpush1.msra.mxu0 %v2962_v43  ;;  %1704 = vmatpush1.msra.mxu1 %v2965_v44 }
 0x5f4   :  { %1634 = vmatprep.subr.mxu0 %v2968_v45  ;;  %1705 = vmatprep.subr.mxu1 %v3475_v58  ;;  %v1777_v58 = vld [vmem:[#allocation5 + $0x8] sm:$0xff] }
 0x5f5   :  { %1635 = vmatpush1.msra.mxu0 %v3476_v54  ;;  %1706 = vmatpush1.msra.mxu1 %v3477_v1  ;;  %v1776_v54 = vld [vmem:[#allocation5] sm:$0xff] }
 0x5f6   :  { %1636 = vmatprep.subr.mxu0 %v3478_v61  ;;  %1707 = vmatprep.subr.mxu1 %v3479_v14  ;;  %v3499_v14 = vld [vmem:[#allocation56_spill] sm:$0xff] }
 0x5f7   :  { %1637 = vmatpush1.msra.mxu0 %v3480_v3  ;;  %1708 = vmatpush1.msra.mxu1 %v3481_v55 }
 0x5f8   :  { %1638 = vmatprep.subr.mxu0 %v3482_v57  ;;  %1709 = vmatprep.subr.mxu1 %v3483_v63 }
 0x5f9   :  { %1639 = vmatpush1.msra.mxu0 %v3484_v4  ;;  %1710 = vmatpush1.msra.mxu1 %v3485_v32  ;;  %v3500_v4 = vld [vmem:[#allocation58_spill] sm:$0xff] }
 0x5fa   :  { %1640 = vmatprep.subr.mxu0 %v3486_v50  ;;  %1711 = vmatprep.subr.mxu1 %v3487_v6  ;;  %v3501_v6 = vld [vmem:[#allocation59_spill] sm:$0xff] }
 0x5fb   :  { %1641 = vmatpush1.msra.mxu0 %v3488_v56  ;;  %1712 = vmatpush1.msra.mxu1 %v3489_v60  ;;  %v3502_v60 = vld [vmem:[#allocation57_spill] sm:$0xff] }
 0x5fc   :  { %1642 = vmatprep.subr.mxu0 %v3490_v23  ;;  %1713 = vmatprep.subr.mxu1 %v3491_v41 }
 0x5fd   :  { %1643 = vmatpush1.msra.mxu0 %v3492_v59  ;;  %1676 = vmatprep.mubr.f32.mxu0 %v3493_v0 }
 0x5fe   :  { %1714 = vmatpush1.msra.mxu1 %v3494_v62  ;;  %1747 = vmatprep.mubr.f32.mxu1 %v3493_v0 }
 0x5ff   :  { %1910 = vmatprep.subr.mxu0 %v3493_v0 }
 0x69e   :  { %v1510_v18 = vpop.f32.mrf.mxu0  ;;  %v1581_v19 = vpop.f32.mrf.mxu1 }
 0x69f   :  { %v1586_v21 = vadd.f32 %v1510_v18, %v3495_v20  ;;  %v1588_v35 = vadd.f32 %v1581_v19, %v3498_v34  ;;  %v1892_v34 = vld [vmem:[%s3219_s5] ss:$0 sm:$0xff] }
 0x6a0   :  { %v1512_v22 = vpop.f32.mrf.mxu0  ;;  %v1583_v24 = vpop.f32.mrf.mxu1 }
 0x6a1   :  { %v1590_v25 = vmul.f32 0.5, %v1586_v21  ;;  %v1587_v27 = vadd.f32 %v1512_v22, %v3496_v26  ;;  %v1589_v33 = vadd.f32 %v1583_v24, %v3497_v7  ;;  %v1592_v36 = vmul.f32 0.5, %v1588_v35 }
 0x6a3   :  { %2013 = vtanh.f32 %v1590_v25  ;;  %v1591_v29 = vmul.f32 0.5, %v1587_v27 }
 0x6a5   :  { %2015 = vtanh.f32 %v1591_v29 }
 0x6a6   :  { %2017 = vtanh.f32 %v1589_v33 }
 0x6a7   :  { %2019 = vtanh.f32 %v1592_v36 }
 0x6b0   :  { %v2014_v37 = vpop.eup %2013 }
 0x6b1   :  { %v1596_v38 = vadd.f32 1.0, %v2014_v37 }
 0x6b2   :  { %v2016_v39 = vpop.eup %2015 }
 0x6b3   :  { %v1599_v40 = vmul.f32 0.5, %v1596_v38  ;;  %v1597_v42 = vadd.f32 1.0, %v2016_v39  ;;  %v2018_v43 = vpop.eup %2017 }
 0x6b4   :  { %v2020_v31 = vpop.eup %2019 }
 0x6b5   :  { %v1600_v44 = vmul.f32 0.5, %v1597_v42  ;;  %v1604_v45 = vmul.f32 %v2018_v43, %v1599_v40  ;;  %v1598_v11 = vadd.f32 1.0, %v2020_v31 }
 0x6b7   :  { %v1603_v2 = vmul.f32 %v1600_v44, %v3111_v8  ;;  %v1601_v46 = vmul.f32 0.5, %v1598_v11  ;;  %v1783_v8 = vld [vmem:[#allocation5 + $0x38] sm:$0xff] }
 0x6b9   :  { %v3184_v30 = vadd.f32 %v1604_v45, %v1603_v2 }
 0x6bb   :  { %2021 = vtanh.f32 %v3184_v30 }
 0x6c8   :  { %v2022_v51 = vpop.eup %2021 }
 0x6c9   :  { %v1607_v53 = vmul.f32 %v2022_v51, %v1601_v46 }
 0x6cb   :  { %1677 = vmatmul.mubr.f32.vlgmr.msra.gmra.mxu0 %v1607_v53  ;;  %1748 = vmatmul.mubr.f32.vlgmr.msra.gmra.mxu1 %v1607_v53 }
 0x6cc   :  { %1911 = vmatpush3.msra.mxu0 %v1791_v5  ;;  %1942 = vmatprep.mubr.msk.f32.mxu0 %vm2148_vm1, %v3493_v0 }
 0x6cd   :  { %1912 = vmatprep.subr.mxu0 %v3493_v0 }
 0x6ce   :  { %1913 = vmatpush3.msra.mxu0 %v1790_v28 }
 0x6cf   :  { %1914 = vmatprep.subr.mxu0 %v3493_v0 }
 0x6d0   :  { %1915 = vmatpush3.msra.mxu0 %v1789_v15 }
 0x6d1   :  { %1916 = vmatprep.subr.mxu0 %v3493_v0 }
 0x6d2   :  { %1917 = vmatpush3.msra.mxu0 %v1788_v13 }
 0x6d3   :  { %1918 = vmatprep.subr.mxu0 %v3493_v0 }
 0x6d4   :  { %1919 = vmatpush3.msra.mxu0 %v1787_v12 }
 0x6d5   :  { %1920 = vmatprep.subr.mxu0 %v3493_v0 }
 0x6d6   :  { %1921 = vmatpush3.msra.mxu0 %v1786_v16 }
 0x6d7   :  { %1922 = vmatprep.subr.mxu0 %v3493_v0 }
 0x6d8   :  { %1923 = vmatpush3.msra.mxu0 %v1785_v9 }
 0x6d9   :  { %1924 = vmatprep.subr.mxu0 %v3493_v0 }
 0x6da   :  { %1925 = vmatpush3.msra.mxu0 %v1784_v10 }
 0x6db   :  { %1926 = vmatprep.subr.mxu0 %v3493_v0 }
 0x6dc   :  { %1927 = vmatpush3.msra.mxu0 %v1783_v8 }
 0x6dd   :  { %1928 = vmatprep.subr.mxu0 %v3493_v0 }
 0x6de   :  { %1929 = vmatpush3.msra.mxu0 %v1782_v48 }
 0x6df   :  { %1930 = vmatprep.subr.mxu0 %v3493_v0 }
 0x6e0   :  { %1931 = vmatpush3.msra.mxu0 %v1781_v47 }
 0x6e1   :  { %1932 = vmatprep.subr.mxu0 %v3493_v0 }
 0x6e2   :  { %1933 = vmatpush3.msra.mxu0 %v1780_v49 }
 0x6e3   :  { %1934 = vmatprep.subr.mxu0 %v3493_v0 }
 0x6e4   :  { %1935 = vmatpush3.msra.mxu0 %v1779_v17 }
 0x6e5   :  { %1936 = vmatprep.subr.mxu0 %v3493_v0 }
 0x6e6   :  { %1937 = vmatpush3.msra.mxu0 %v1778_v52 }
 0x6e7   :  { %1938 = vmatprep.subr.mxu0 %v3493_v0 }
 0x6e8   :  { %1939 = vmatpush3.msra.mxu0 %v1777_v58 }
 0x6e9   :  { %1940 = vmatprep.subr.mxu0 %v3493_v0 }
 0x6ea   :  { %1941 = vmatpush3.msra.mxu0 %v1776_v54 }
 0x78b   :  { %v1678_v1 = vpop.f32.mrf.mxu0  ;;  %v1749_v61 = vpop.f32.mrf.mxu1 }
 0x78c   :  { %v1754_v3 = vadd.f32 %v1678_v1, %v3499_v14  ;;  %v1756_v23 = vadd.f32 %v1749_v61, %v3502_v60 }
 0x78d   :  { %v1680_v55 = vpop.f32.mrf.mxu0  ;;  %v1751_v57 = vpop.f32.mrf.mxu1 }
 0x78e   :  { %v1758_v63 = vmul.f32 0.5, %v1754_v3  ;;  %v1755_v32 = vadd.f32 %v1680_v55, %v3500_v4  ;;  %v1757_v56 = vadd.f32 %v1751_v57, %v3501_v6  ;;  %v1760_v41 = vmul.f32 0.5, %v1756_v23 }
 0x790   :  { %2023 = vtanh.f32 %v1758_v63  ;;  %v1759_v50 = vmul.f32 0.5, %v1755_v32 }
 0x792   :  { %2025 = vtanh.f32 %v1759_v50 }
 0x793   :  { %2027 = vtanh.f32 %v1757_v56 }
 0x794   :  { %2029 = vtanh.f32 %v1760_v41 }
 0x79d   :  { %v2024_v59 = vpop.eup %2023 }
 0x79e   :  { %v1764_v0 = vadd.f32 1.0, %v2024_v59 }
 0x79f   :  { %v2026_v62 = vpop.eup %2025 }
 0x7a0   :  { %v1767_v18 = vmul.f32 0.5, %v1764_v0  ;;  %v1765_v19 = vadd.f32 1.0, %v2026_v62  ;;  %v2028_v20 = vpop.eup %2027 }
 0x7a1   :  { %v2030_v26 = vpop.eup %2029 }
 0x7a2   :  { %v1768_v21 = vmul.f32 0.5, %v1765_v19  ;;  %v1772_v22 = vmul.f32 %v2028_v20, %v1767_v18  ;;  %v1766_v27 = vadd.f32 1.0, %v2030_v26 }
 0x7a4   :  { %v1771_v24 = vmul.f32 %v1768_v21, %v3184_v30  ;;  %v1769_v29 = vmul.f32 0.5, %v1766_v27 }
 0x7a6   :  { %v1773_v25 = vadd.f32 %v1772_v22, %v1771_v24 }
 0x7a8   :  { %2031 = vtanh.f32 %v1773_v25 }
 0x7b5   :  { %v2032_v7 = vpop.eup %2031 }
 0x7b6   :  { %v1775_v33 = vmul.f32 %v2032_v7, %v1769_v29 }
 0x7b8   :  { %1943 = vmatmul.mubr.f32.vlgmr.msra.gmra.mxu0 %v1775_v33 }
 0x878   :  { %v1865_v35 = vpop.f32.mrf.mxu0 }
 0x879   :  { %v1866_v36 = vadd.f32 %v1892_v34, %v1865_v35 }
 0x87a   :  { %v1944_v37 = vpop.f32.mrf.mxu0 }
 0x87b   :  { %1869 = vst [vmem:[%s3220_s6] sm:$0xff] %v1866_v36 }
 0x87c   :  { %1874 = vsyncpa [#allocation4], 1 }
 0x87d   :  { %1875 = vsyncpa [#allocation6], 1 }

</bundles_post_ra>
